<compile_context>
chip_gen: v6e
topology: v6e:2x2x1
jax: 0.10.0
libtpu: 0.0.40
codegen_flags: <defaults>
</compile_context>

<pallas_src>
import functools
import math

import jax
import jax.numpy as jnp
import numpy as np
from jax import lax
from jax.experimental import pallas as pl
from jax.experimental.pallas import tpu as pltpu

_LANE = 128


def _round_up(x, m):
    return ((x + m - 1) // m) * m


def _max_pool_nhwc(act, pool_kernel, pool_stride):
    """Max-pool an NHWC register value over H and W (PyTorch floor mode)."""
    n, hc, wc, c = act.shape
    ho = (hc - pool_kernel) // pool_stride + 1
    wo = (wc - pool_kernel) // pool_stride + 1
    # H pooling: contiguous windows on a major axis, static unroll.
    rows = []
    for i in range(ho):
        win = act[:, i * pool_stride: i * pool_stride + pool_kernel]
        rows.append(jnp.max(win, axis=1, keepdims=True))
    h = rows[0] if ho == 1 else jnp.concatenate(rows, axis=1)          # (n, ho, wc, c)
    # W pooling: contiguous windows on the second-minor axis, static unroll.
    cols = []
    for j in range(wo):
        win = h[:, :, j * pool_stride: j * pool_stride + pool_kernel]
        cols.append(jnp.max(win, axis=2, keepdims=True))
    return cols[0] if wo == 1 else jnp.concatenate(cols, axis=2)       # (n, ho, wo, c)


def _make_conv_cell_kernel(N, Hc, Wc, Ho, Wo, Coutp,
                           pool_kernel, pool_stride, negative_slope, eps):
    M2 = N * Ho * Wo
    inv_cnt = 1.0 / float(M2)

    def kernel(p_ref, w_ref, b_ref, g_ref, be_ref, o_ref):
        # One fused MXU matmul: (N*Hc*Wc, Kp) x (Kp, Coutp) with f32 accumulation.
        acc = jnp.dot(p_ref[...], w_ref[...], preferred_element_type=jnp.float32)
        conv = acc.reshape(N, Hc, Wc, Coutp)                           # conv output (no bias yet)

        # Max-pool the raw conv output; bias + leaky-relu applied afterwards:
        # per-channel bias commutes with max and leaky-relu (0<=slope<=1) is
        # monotone, so pool(leaky(conv+bias)) == leaky(pool(conv)+bias).
        pooled = _max_pool_nhwc(conv, pool_kernel, pool_stride)        # (N, Ho, Wo, Coutp)
        y = pooled.reshape(M2, Coutp) + b_ref[...]
        y = jnp.maximum(y, negative_slope * y)                         # leaky relu

        # BatchNorm2d (training mode): batch mean / biased variance over (N,Ho,Wo).
        mean = jnp.sum(y, axis=0, keepdims=True) * inv_cnt             # (1, Coutp)
        var = jnp.sum(y * y, axis=0, keepdims=True) * inv_cnt - mean * mean
        var = jnp.maximum(var, 0.0)                                    # guard E[x^2]-mean^2 cancellation
        inv = lax.rsqrt(var + eps)
        scale = g_ref[...] * inv
        shift = be_ref[...] - mean * scale
        o_ref[...] = (y * scale + shift).reshape(N, Ho, Wo, Coutp)     # single dense store

    return kernel


def conv_cell_forward(x_nchw, w_hwio, bias, gamma, beta, *,
                      padding, pool_kernel, pool_stride, negative_slope,
                      eps=1e-5, matmul_dtype=jnp.float32):
    """ConvCell forward. x_nchw: (N, Cin, H, W) float32. Returns (N, Cout, Ho, Wo)."""
    assert 0.0 <= negative_slope <= 1.0, "max-form leaky-relu / pool commutation needs slope in [0,1]"
    N, Cin, H, W = x_nchw.shape
    KH, KW, Cin_w, Cout = w_hwio.shape
    assert Cin_w == Cin

    # conv output spatial size (stride 1), max-pool output (PyTorch floor mode)
    Hc = H + 2 * padding - KH + 1
    Wc = W + 2 * padding - KW + 1
    Ho = (Hc - pool_kernel) // pool_stride + 1
    Wo = (Wc - pool_kernel) // pool_stride + 1

    K = KH * KW * Cin
    Kp = _round_up(K, _LANE)          # lane-dense contraction operand
    Coutp = _round_up(Cout, _LANE)    # lane-dense MXU-N / store axis
    M = N * Hc * Wc                   # batch folded into matmul M

    # ---- XLA-side glue: NCHW -> NHWC, spatial zero-pad, im2col (the lane
    # shuffles live here, not in the kernel), lane-dense padding of params ----
    x_nhwc = jnp.transpose(x_nchw, (0, 2, 3, 1)).astype(jnp.float32)
    x_pad = jnp.pad(x_nhwc, ((0, 0), (padding, padding), (padding, padding), (0, 0)))
    taps = [x_pad[:, i:i + Hc, j:j + Wc, :] for i in range(KH) for j in range(KW)]
    patches = jnp.concatenate(taps, axis=-1).reshape(M, K)             # (i, j, cin) ordering
    patches = jnp.pad(patches, ((0, 0), (0, Kp - K))).astype(matmul_dtype)

    w2d = w_hwio.astype(jnp.float32).reshape(K, Cout)                  # matches (i, j, cin) rows
    w2d = jnp.pad(w2d, ((0, Kp - K), (0, Coutp - Cout))).astype(matmul_dtype)
    cpad = ((0, 0), (0, Coutp - Cout))
    bias2d = jnp.pad(bias.astype(jnp.float32).reshape(1, Cout), cpad)
    gamma2d = jnp.pad(gamma.astype(jnp.float32).reshape(1, Cout), cpad)
    beta2d = jnp.pad(beta.astype(jnp.float32).reshape(1, Cout), cpad)

    kernel = _make_conv_cell_kernel(N, Hc, Wc, Ho, Wo, Coutp,
                                    pool_kernel, pool_stride, negative_slope, eps)

    opnd_bytes = jnp.dtype(matmul_dtype).itemsize
    cost = pl.CostEstimate(
        flops=2 * M * Kp * Coutp,
        transcendentals=Coutp,
        bytes_accessed=(M * Kp + Kp * Coutp) * opnd_bytes
        + 3 * Coutp * 4 + N * Ho * Wo * Coutp * 4,
    )

    out = pl.pallas_call(
        kernel,
        out_shape=jax.ShapeDtypeStruct((N, Ho, Wo, Coutp), jnp.float32),
        grid_spec=pltpu.PrefetchScalarGridSpec(
            num_scalar_prefetch=0,
            grid=(1,),                                                  # whole problem in one step
            in_specs=[
                pl.BlockSpec((M, Kp), lambda i: (0, 0)),
                pl.BlockSpec((Kp, Coutp), lambda i: (0, 0)),
                pl.BlockSpec((1, Coutp), lambda i: (0, 0)),
                pl.BlockSpec((1, Coutp), lambda i: (0, 0)),
                pl.BlockSpec((1, Coutp), lambda i: (0, 0)),
            ],
            out_specs=pl.BlockSpec((N, Ho, Wo, Coutp), lambda i: (0, 0, 0, 0)),
        ),
        compiler_params=pltpu.CompilerParams(dimension_semantics=("arbitrary",)),
        cost_estimate=cost,
    )(patches, w2d, bias2d, gamma2d, beta2d)

    out = out[:, :, :, :Cout]                       # drop channel padding
    return jnp.transpose(out, (0, 3, 1, 2))         # back to NCHW


def reference_forward(x_nchw, w_hwio, bias, gamma, beta, *,
                      padding, pool_kernel, pool_stride, negative_slope, eps=1e-5):
    """Pure-JAX reference (same math as PyTorch ConvCell.forward, training-mode BN)."""
    x = jnp.transpose(x_nchw, (0, 2, 3, 1))
    y = lax.conv_general_dilated(
        x, w_hwio, window_strides=(1, 1),
        padding=[(padding, padding), (padding, padding)],
        dimension_numbers=("NHWC", "HWIO", "NHWC"))
    y = y + bias.reshape(1, 1, 1, -1)
    y = jnp.where(y > 0, y, negative_slope * y)
    y = lax.reduce_window(
        y, -jnp.inf, lax.max,
        window_dimensions=(1, pool_kernel, pool_kernel, 1),
        window_strides=(1, pool_stride, pool_stride, 1),
        padding="VALID")
    mean = jnp.mean(y, axis=(0, 1, 2), keepdims=True)
    var = jnp.mean((y - mean) ** 2, axis=(0, 1, 2), keepdims=True)
    y = (y - mean) * lax.rsqrt(var + eps) * gamma.reshape(1, 1, 1, -1) \
        + beta.reshape(1, 1, 1, -1)
    return jnp.transpose(y, (0, 3, 1, 2))


if __name__ == "__main__":
    # Module hyper-parameters (small, consistent with ConvCell.__init__)
    N, Cin, H, W = 2, 4, 16, 16
    Cout = 8
    conv_kernel_size = 3
    padding = 1
    pool_kernel_size = 2
    pool_stride = 2
    negative_slope = 0.1

    key = jax.random.PRNGKey(0)
    kx, kw, kb = jax.random.split(key, 3)

    # Input
    x = jax.random.normal(kx, (N, Cin, H, W), dtype=jnp.float32)

    # Deterministic parameter init mirroring the PyTorch __init__ distributions:
    # kaiming_normal_(weight, a=negative_slope, nonlinearity='leaky_relu'), fan_in mode.
    fan_in = Cin * conv_kernel_size * conv_kernel_size
    gain = math.sqrt(2.0 / (1.0 + negative_slope ** 2))
    std = gain / math.sqrt(fan_in)
    w_hwio = std * jax.random.normal(
        kw, (conv_kernel_size, conv_kernel_size, Cin, Cout), dtype=jnp.float32)
    # Conv2d default bias init: U(-1/sqrt(fan_in), 1/sqrt(fan_in))
    bound = 1.0 / math.sqrt(fan_in)
    bias = jax.random.uniform(kb, (Cout,), minval=-bound, maxval=bound, dtype=jnp.float32)
    # BatchNorm2d default affine params
    gamma = jnp.ones((Cout,), jnp.float32)
    beta = jnp.zeros((Cout,), jnp.float32)

    ref = reference_forward(
        x, w_hwio, bias, gamma, beta,
        padding=padding, pool_kernel=pool_kernel_size, pool_stride=pool_stride,
        negative_slope=negative_slope)
    ref = jax.block_until_ready(ref)

    # f32 MXU operands: bit-close to the reference (tight tolerance).
    fwd_f32 = jax.jit(functools.partial(
        conv_cell_forward,
        padding=padding, pool_kernel=pool_kernel_size, pool_stride=pool_stride,
        negative_slope=negative_slope, matmul_dtype=jnp.float32))
    out_f32 = jax.block_until_ready(fwd_f32(x, w_hwio, bias, gamma, beta))
    np.testing.assert_allclose(np.asarray(out_f32), np.asarray(ref), rtol=1e-3, atol=1e-3)

    # bf16 MXU operands (the fast path on v6e/v7x): f32 accumulation + f32 epilogue,
    # checked against the f32 reference at a bf16-appropriate tolerance.
    fwd_bf16 = jax.jit(functools.partial(
        conv_cell_forward,
        padding=padding, pool_kernel=pool_kernel_size, pool_stride=pool_stride,
        negative_slope=negative_slope, matmul_dtype=jnp.bfloat16))
    out_bf16 = jax.block_until_ready(fwd_bf16(x, w_hwio, bias, gamma, beta))
    np.testing.assert_allclose(np.asarray(out_bf16), np.asarray(ref), rtol=3e-2, atol=3e-2)

    print("KERNEL_OK")
</pallas_src>

<mosaic_0001>
module attributes {stable_mosaic.version = 11 : i64} {
  func.func @kernel(%arg0: i32, %arg1: memref<512x128xf32, #tpu.memory_space<vmem>>, %arg2: memref<128x128xf32, #tpu.memory_space<vmem>>, %arg3: memref<1x128xf32, #tpu.memory_space<vmem>>, %arg4: memref<1x128xf32, #tpu.memory_space<vmem>>, %arg5: memref<1x128xf32, #tpu.memory_space<vmem>>, %arg6: memref<2x8x8x128xf32, #tpu.memory_space<vmem>>) attributes {dimension_semantics = [#tpu.dimension_semantics<arbitrary>], iteration_bounds = array<i64: 1>, scalar_prefetch = 0 : i64, scratch_operands = 0 : i64, tpu.core_type = #tpu.core_type<tc>, window_params = [{pipeline_mode = #tpu.pipeline_mode<synchronous>, transform_indices = @transform_0, window_bounds = array<i64: 512, 128>}, {pipeline_mode = #tpu.pipeline_mode<synchronous>, transform_indices = @transform_1, window_bounds = array<i64: 128, 128>}, {pipeline_mode = #tpu.pipeline_mode<synchronous>, transform_indices = @transform_2, window_bounds = array<i64: 1, 128>}, {pipeline_mode = #tpu.pipeline_mode<synchronous>, transform_indices = @transform_3, window_bounds = array<i64: 1, 128>}, {pipeline_mode = #tpu.pipeline_mode<synchronous>, transform_indices = @transform_4, window_bounds = array<i64: 1, 128>}, {pipeline_mode = #tpu.pipeline_mode<synchronous>, transform_indices = @transform_5, window_bounds = array<i64: 2, 8, 8, 128>}]} {
    %c0 = arith.constant 0 : index
    %c0_0 = arith.constant 0 : index
    %0 = vector.load %arg1[%c0, %c0_0] : memref<512x128xf32, #tpu.memory_space<vmem>>, vector<512x128xf32>
    %c0_1 = arith.constant 0 : index
    %c0_2 = arith.constant 0 : index
    %1 = vector.load %arg2[%c0_1, %c0_2] : memref<128x128xf32, #tpu.memory_space<vmem>>, vector<128x128xf32>
    %cst = arith.constant dense<0.000000e+00> : vector<512x128xf32>
    %2 = tpu.matmul %0, %1, %cst {dimension_numbers = #tpu.dot_dimension_numbers<[1], [0], [0], [1], [0, 0, 1, 1], [], []>} : vector<512x128xf32>, vector<128x128xf32>, vector<512x128xf32> -> vector<512x128xf32>
    %3 = vector.shape_cast %2 : vector<512x128xf32> to vector<2x16x16x128xf32>
    %4 = vector.extract_strided_slice %3 {offsets = [0, 0, 0, 0], sizes = [2, 2, 16, 128], strides = [1, 1, 1, 1]} : vector<2x16x16x128xf32> to vector<2x2x16x128xf32>
    %cst_3 = arith.constant dense<0xFF800000> : vector<2x16x128xf32>
    %5 = vector.multi_reduction <maximumf>, %4, %cst_3 [1] : vector<2x2x16x128xf32> to vector<2x16x128xf32>
    %6 = vector.shape_cast %5 : vector<2x16x128xf32> to vector<2x1x16x128xf32>
    %7 = vector.extract_strided_slice %3 {offsets = [0, 2, 0, 0], sizes = [2, 2, 16, 128], strides = [1, 1, 1, 1]} : vector<2x16x16x128xf32> to vector<2x2x16x128xf32>
    %cst_4 = arith.constant dense<0xFF800000> : vector<2x16x128xf32>
    %8 = vector.multi_reduction <maximumf>, %7, %cst_4 [1] : vector<2x2x16x128xf32> to vector<2x16x128xf32>
    %9 = vector.shape_cast %8 : vector<2x16x128xf32> to vector<2x1x16x128xf32>
    %10 = vector.extract_strided_slice %3 {offsets = [0, 4, 0, 0], sizes = [2, 2, 16, 128], strides = [1, 1, 1, 1]} : vector<2x16x16x128xf32> to vector<2x2x16x128xf32>
    %cst_5 = arith.constant dense<0xFF800000> : vector<2x16x128xf32>
    %11 = vector.multi_reduction <maximumf>, %10, %cst_5 [1] : vector<2x2x16x128xf32> to vector<2x16x128xf32>
    %12 = vector.shape_cast %11 : vector<2x16x128xf32> to vector<2x1x16x128xf32>
    %13 = vector.extract_strided_slice %3 {offsets = [0, 6, 0, 0], sizes = [2, 2, 16, 128], strides = [1, 1, 1, 1]} : vector<2x16x16x128xf32> to vector<2x2x16x128xf32>
    %cst_6 = arith.constant dense<0xFF800000> : vector<2x16x128xf32>
    %14 = vector.multi_reduction <maximumf>, %13, %cst_6 [1] : vector<2x2x16x128xf32> to vector<2x16x128xf32>
    %15 = vector.shape_cast %14 : vector<2x16x128xf32> to vector<2x1x16x128xf32>
    %16 = vector.extract_strided_slice %3 {offsets = [0, 8, 0, 0], sizes = [2, 2, 16, 128], strides = [1, 1, 1, 1]} : vector<2x16x16x128xf32> to vector<2x2x16x128xf32>
    %cst_7 = arith.constant dense<0xFF800000> : vector<2x16x128xf32>
    %17 = vector.multi_reduction <maximumf>, %16, %cst_7 [1] : vector<2x2x16x128xf32> to vector<2x16x128xf32>
    %18 = vector.shape_cast %17 : vector<2x16x128xf32> to vector<2x1x16x128xf32>
    %19 = vector.extract_strided_slice %3 {offsets = [0, 10, 0, 0], sizes = [2, 2, 16, 128], strides = [1, 1, 1, 1]} : vector<2x16x16x128xf32> to vector<2x2x16x128xf32>
    %cst_8 = arith.constant dense<0xFF800000> : vector<2x16x128xf32>
    %20 = vector.multi_reduction <maximumf>, %19, %cst_8 [1] : vector<2x2x16x128xf32> to vector<2x16x128xf32>
    %21 = vector.shape_cast %20 : vector<2x16x128xf32> to vector<2x1x16x128xf32>
    %22 = vector.extract_strided_slice %3 {offsets = [0, 12, 0, 0], sizes = [2, 2, 16, 128], strides = [1, 1, 1, 1]} : vector<2x16x16x128xf32> to vector<2x2x16x128xf32>
    %cst_9 = arith.constant dense<0xFF800000> : vector<2x16x128xf32>
    %23 = vector.multi_reduction <maximumf>, %22, %cst_9 [1] : vector<2x2x16x128xf32> to vector<2x16x128xf32>
    %24 = vector.shape_cast %23 : vector<2x16x128xf32> to vector<2x1x16x128xf32>
    %25 = vector.extract_strided_slice %3 {offsets = [0, 14, 0, 0], sizes = [2, 2, 16, 128], strides = [1, 1, 1, 1]} : vector<2x16x16x128xf32> to vector<2x2x16x128xf32>
    %cst_10 = arith.constant dense<0xFF800000> : vector<2x16x128xf32>
    %26 = vector.multi_reduction <maximumf>, %25, %cst_10 [1] : vector<2x2x16x128xf32> to vector<2x16x128xf32>
    %27 = vector.shape_cast %26 : vector<2x16x128xf32> to vector<2x1x16x128xf32>
    %28 = tpu.concatenate %6, %9, %12, %15, %18, %21, %24, %27 in 1 : vector<2x1x16x128xf32>, vector<2x1x16x128xf32>, vector<2x1x16x128xf32>, vector<2x1x16x128xf32>, vector<2x1x16x128xf32>, vector<2x1x16x128xf32>, vector<2x1x16x128xf32>, vector<2x1x16x128xf32> -> vector<2x8x16x128xf32>
    %29 = vector.extract_strided_slice %28 {offsets = [0, 0, 0, 0], sizes = [2, 8, 2, 128], strides = [1, 1, 1, 1]} : vector<2x8x16x128xf32> to vector<2x8x2x128xf32>
    %cst_11 = arith.constant dense<0xFF800000> : vector<2x8x128xf32>
    %30 = vector.multi_reduction <maximumf>, %29, %cst_11 [2] : vector<2x8x2x128xf32> to vector<2x8x128xf32>
    %31 = vector.shape_cast %30 : vector<2x8x128xf32> to vector<2x8x1x128xf32>
    %32 = vector.extract_strided_slice %28 {offsets = [0, 0, 2, 0], sizes = [2, 8, 2, 128], strides = [1, 1, 1, 1]} : vector<2x8x16x128xf32> to vector<2x8x2x128xf32>
    %cst_12 = arith.constant dense<0xFF800000> : vector<2x8x128xf32>
    %33 = vector.multi_reduction <maximumf>, %32, %cst_12 [2] : vector<2x8x2x128xf32> to vector<2x8x128xf32>
    %34 = vector.shape_cast %33 : vector<2x8x128xf32> to vector<2x8x1x128xf32>
    %35 = vector.extract_strided_slice %28 {offsets = [0, 0, 4, 0], sizes = [2, 8, 2, 128], strides = [1, 1, 1, 1]} : vector<2x8x16x128xf32> to vector<2x8x2x128xf32>
    %cst_13 = arith.constant dense<0xFF800000> : vector<2x8x128xf32>
    %36 = vector.multi_reduction <maximumf>, %35, %cst_13 [2] : vector<2x8x2x128xf32> to vector<2x8x128xf32>
    %37 = vector.shape_cast %36 : vector<2x8x128xf32> to vector<2x8x1x128xf32>
    %38 = vector.extract_strided_slice %28 {offsets = [0, 0, 6, 0], sizes = [2, 8, 2, 128], strides = [1, 1, 1, 1]} : vector<2x8x16x128xf32> to vector<2x8x2x128xf32>
    %cst_14 = arith.constant dense<0xFF800000> : vector<2x8x128xf32>
    %39 = vector.multi_reduction <maximumf>, %38, %cst_14 [2] : vector<2x8x2x128xf32> to vector<2x8x128xf32>
    %40 = vector.shape_cast %39 : vector<2x8x128xf32> to vector<2x8x1x128xf32>
    %41 = vector.extract_strided_slice %28 {offsets = [0, 0, 8, 0], sizes = [2, 8, 2, 128], strides = [1, 1, 1, 1]} : vector<2x8x16x128xf32> to vector<2x8x2x128xf32>
    %cst_15 = arith.constant dense<0xFF800000> : vector<2x8x128xf32>
    %42 = vector.multi_reduction <maximumf>, %41, %cst_15 [2] : vector<2x8x2x128xf32> to vector<2x8x128xf32>
    %43 = vector.shape_cast %42 : vector<2x8x128xf32> to vector<2x8x1x128xf32>
    %44 = vector.extract_strided_slice %28 {offsets = [0, 0, 10, 0], sizes = [2, 8, 2, 128], strides = [1, 1, 1, 1]} : vector<2x8x16x128xf32> to vector<2x8x2x128xf32>
    %cst_16 = arith.constant dense<0xFF800000> : vector<2x8x128xf32>
    %45 = vector.multi_reduction <maximumf>, %44, %cst_16 [2] : vector<2x8x2x128xf32> to vector<2x8x128xf32>
    %46 = vector.shape_cast %45 : vector<2x8x128xf32> to vector<2x8x1x128xf32>
    %47 = vector.extract_strided_slice %28 {offsets = [0, 0, 12, 0], sizes = [2, 8, 2, 128], strides = [1, 1, 1, 1]} : vector<2x8x16x128xf32> to vector<2x8x2x128xf32>
    %cst_17 = arith.constant dense<0xFF800000> : vector<2x8x128xf32>
    %48 = vector.multi_reduction <maximumf>, %47, %cst_17 [2] : vector<2x8x2x128xf32> to vector<2x8x128xf32>
    %49 = vector.shape_cast %48 : vector<2x8x128xf32> to vector<2x8x1x128xf32>
    %50 = vector.extract_strided_slice %28 {offsets = [0, 0, 14, 0], sizes = [2, 8, 2, 128], strides = [1, 1, 1, 1]} : vector<2x8x16x128xf32> to vector<2x8x2x128xf32>
    %cst_18 = arith.constant dense<0xFF800000> : vector<2x8x128xf32>
    %51 = vector.multi_reduction <maximumf>, %50, %cst_18 [2] : vector<2x8x2x128xf32> to vector<2x8x128xf32>
    %52 = vector.shape_cast %51 : vector<2x8x128xf32> to vector<2x8x1x128xf32>
    %53 = tpu.concatenate %31, %34, %37, %40, %43, %46, %49, %52 in 2 : vector<2x8x1x128xf32>, vector<2x8x1x128xf32>, vector<2x8x1x128xf32>, vector<2x8x1x128xf32>, vector<2x8x1x128xf32>, vector<2x8x1x128xf32>, vector<2x8x1x128xf32>, vector<2x8x1x128xf32> -> vector<2x8x8x128xf32>
    %54 = vector.shape_cast %53 : vector<2x8x8x128xf32> to vector<128x128xf32>
    %c0_19 = arith.constant 0 : index
    %c0_20 = arith.constant 0 : index
    %55 = vector.load %arg3[%c0_19, %c0_20] : memref<1x128xf32, #tpu.memory_space<vmem>>, vector<1x128xf32>
    %56 = vector.broadcast %55 : vector<1x128xf32> to vector<128x128xf32>
    %57 = arith.addf %54, %56 : vector<128x128xf32>
    %cst_21 = arith.constant 1.000000e-01 : f32
    %58 = vector.broadcast %cst_21 : f32 to vector<128x128xf32>
    %59 = arith.mulf %58, %57 : vector<128x128xf32>
    %60 = arith.maximumf %57, %59 : vector<128x128xf32>
    %cst_22 = arith.constant dense<0.000000e+00> : vector<128xf32>
    %61 = vector.multi_reduction <add>, %60, %cst_22 [0] : vector<128x128xf32> to vector<128xf32>
    %62 = vector.shape_cast %61 : vector<128xf32> to vector<1x128xf32>
    %cst_23 = arith.constant 7.812500e-03 : f32
    %63 = vector.broadcast %cst_23 : f32 to vector<1x128xf32>
    %64 = arith.mulf %62, %63 : vector<1x128xf32>
    %65 = arith.mulf %60, %60 : vector<128x128xf32>
    %cst_24 = arith.constant dense<0.000000e+00> : vector<128xf32>
    %66 = vector.multi_reduction <add>, %65, %cst_24 [0] : vector<128x128xf32> to vector<128xf32>
    %67 = vector.shape_cast %66 : vector<128xf32> to vector<1x128xf32>
    %cst_25 = arith.constant 7.812500e-03 : f32
    %68 = vector.broadcast %cst_25 : f32 to vector<1x128xf32>
    %69 = arith.mulf %67, %68 : vector<1x128xf32>
    %70 = arith.mulf %64, %64 : vector<1x128xf32>
    %71 = arith.subf %69, %70 : vector<1x128xf32>
    %cst_26 = arith.constant 0.000000e+00 : f32
    %72 = vector.broadcast %cst_26 : f32 to vector<1x128xf32>
    %73 = arith.maximumf %71, %72 : vector<1x128xf32>
    %cst_27 = arith.constant 9.99999974E-6 : f32
    %74 = vector.broadcast %cst_27 : f32 to vector<1x128xf32>
    %75 = arith.addf %73, %74 : vector<1x128xf32>
    %76 = math.rsqrt %75 : vector<1x128xf32>
    %c0_28 = arith.constant 0 : index
    %c0_29 = arith.constant 0 : index
    %77 = vector.load %arg4[%c0_28, %c0_29] : memref<1x128xf32, #tpu.memory_space<vmem>>, vector<1x128xf32>
    %78 = arith.mulf %77, %76 : vector<1x128xf32>
    %c0_30 = arith.constant 0 : index
    %c0_31 = arith.constant 0 : index
    %79 = vector.load %arg5[%c0_30, %c0_31] : memref<1x128xf32, #tpu.memory_space<vmem>>, vector<1x128xf32>
    %80 = arith.mulf %64, %78 : vector<1x128xf32>
    %81 = arith.subf %79, %80 : vector<1x128xf32>
    %82 = vector.broadcast %78 : vector<1x128xf32> to vector<128x128xf32>
    %83 = arith.mulf %60, %82 : vector<128x128xf32>
    %84 = vector.broadcast %81 : vector<1x128xf32> to vector<128x128xf32>
    %85 = arith.addf %83, %84 : vector<128x128xf32>
    %86 = vector.shape_cast %85 : vector<128x128xf32> to vector<2x8x8x128xf32>
    %c0_32 = arith.constant 0 : index
    %c0_33 = arith.constant 0 : index
    %c0_34 = arith.constant 0 : index
    %c0_35 = arith.constant 0 : index
    %87 = vector.load %arg6[%c0_32, %c0_33, %c0_34, %c0_35] : memref<2x8x8x128xf32, #tpu.memory_space<vmem>>, vector<2x8x8x128xf32>
    tpu.vector_store %arg6[%c0_32, %c0_33, %c0_34, %c0_35], %86 {strides = array<i32>} : memref<2x8x8x128xf32, #tpu.memory_space<vmem>>, vector<2x8x8x128xf32>,
    return
  }
  func.func @transform_0(%arg0: i32) -> (i32, i32) {
    %c0_i32 = arith.constant 0 : i32
    %c0_i32_0 = arith.constant 0 : i32
    %c0_i32_1 = arith.constant 0 : i32
    return %c0_i32, %c0_i32_0 : i32, i32
  }
  func.func @transform_1(%arg0: i32) -> (i32, i32) {
    %c0_i32 = arith.constant 0 : i32
    %c0_i32_0 = arith.constant 0 : i32
    %c0_i32_1 = arith.constant 0 : i32
    return %c0_i32, %c0_i32_0 : i32, i32
  }
  func.func @transform_2(%arg0: i32) -> (i32, i32) {
    %c0_i32 = arith.constant 0 : i32
    %c0_i32_0 = arith.constant 0 : i32
    %c0_i32_1 = arith.constant 0 : i32
    return %c0_i32, %c0_i32_0 : i32, i32
  }
  func.func @transform_3(%arg0: i32) -> (i32, i32) {
    %c0_i32 = arith.constant 0 : i32
    %c0_i32_0 = arith.constant 0 : i32
    %c0_i32_1 = arith.constant 0 : i32
    return %c0_i32, %c0_i32_0 : i32, i32
  }
  func.func @transform_4(%arg0: i32) -> (i32, i32) {
    %c0_i32 = arith.constant 0 : i32
    %c0_i32_0 = arith.constant 0 : i32
    %c0_i32_1 = arith.constant 0 : i32
    return %c0_i32, %c0_i32_0 : i32, i32
  }
  func.func @transform_5(%arg0: i32) -> (i32, i32, i32, i32) {
    %c0_i32 = arith.constant 0 : i32
    %c0_i32_0 = arith.constant 0 : i32
    %c0_i32_1 = arith.constant 0 : i32
    %c0_i32_2 = arith.constant 0 : i32
    %c0_i32_3 = arith.constant 0 : i32
    return %c0_i32, %c0_i32_0, %c0_i32_1, %c0_i32_2 : i32, i32, i32, i32
  }
}

</mosaic_0001>

<bundles_post_ra>
// kernel: conv_cell_forward.1
= control target key start
LH: loop header
LB: loop body
LE: loop exit
PB: predicated region body
PF: predicated region fallthrough
CT: control target
= control target key end

     0   :  { %vm517_vm0 = vcmask 1041408   ;;  %vm630_vm1 = vcmask 1043458   ;;  %vm743_vm2 = vcmask 1045508   ;;  %vm856_vm3 = vcmask 1047558   ;;  %s3044_s1 = inlined_call_operand.vmem [shape: f32[128,128], index: 1, kind: input, shape index: {}]   ;;  %s3045_s0 = inlined_call_operand.vmem [shape: f32[512,128], index: 0, kind: input, shape index: {}]   ;;  %s3046_s2 = inlined_call_operand.vmem [shape: f32[1,128], index: 2, kind: input, shape index: {}]   ;;  %s3047_s3 = inlined_call_operand.vmem [shape: f32[1,128], index: 3, kind: input, shape index: {}]   ;;  %s3048_s4 = inlined_call_operand.vmem [shape: f32[1,128], index: 4, kind: input, shape index: {}]   ;;  %s3049_s5 = inlined_call_operand.vmem [shape: f32[2,8,8,128], index: 5, kind: output, shape index: {}]  }
   0x1   :  { %v99_v0 = vld [vmem:[%s3044_s1 + $0x78] sm:$0xff]  ;;  %v98_v1 = vld [vmem:[%s3044_s1 + $0x70] sm:$0xff]  ;;  %v97_v2 = vld [vmem:[%s3044_s1 + $0x68] sm:$0xff]  ;;  %vm1417_vm4 = vcmask 1040384   ;;  %vm1450_vm5 = vcmask 1042432   ;;  %vm1467_vm6 = vcmask 1043456  }
   0x2   :  { %1805 = vmatprep.subr.mxu0 %v99_v0  ;;  %1933 = vmatprep.subr.mxu1 %v99_v0  ;;  %v96_v3 = vld [vmem:[%s3044_s1 + $0x60] sm:$0xff]  ;;  %v95_v4 = vld [vmem:[%s3044_s1 + $0x58] sm:$0xff]  ;;  %v94_v5 = vld [vmem:[%s3044_s1 + $0x50] sm:$0xff]  ;;  %vm1484_vm7 = vcmask 1044480   ;;  %vm1501_vm8 = vcmask 1045504   ;;  %vm1518_vm9 = vcmask 1046528  }
   0x3   :  { %1806 = vmatpush3.msra.mxu0 %v99_v0  ;;  %1949 = vmatpush3.msra.mxu1 %v99_v0  ;;  %v93_v6 = vld [vmem:[%s3044_s1 + $0x48] sm:$0xff]  ;;  %v92_v7 = vld [vmem:[%s3044_s1 + $0x40] sm:$0xff]  ;;  %v91_v8 = vld [vmem:[%s3044_s1 + $0x38] sm:$0xff] }
   0x4   :  { %1807 = vmatprep.subr.mxu0 %v98_v1  ;;  %1934 = vmatprep.subr.mxu1 %v98_v1  ;;  %v90_v9 = vld [vmem:[%s3044_s1 + $0x30] sm:$0xff]  ;;  %v89_v10 = vld [vmem:[%s3044_s1 + $0x28] sm:$0xff]  ;;  %v88_v11 = vld [vmem:[%s3044_s1 + $0x20] sm:$0xff] }
   0x5   :  { %1808 = vmatpush3.msra.mxu0 %v98_v1  ;;  %1950 = vmatpush3.msra.mxu1 %v98_v1  ;;  %v87_v12 = vld [vmem:[%s3044_s1 + $0x18] sm:$0xff]  ;;  %v86_v13 = vld [vmem:[%s3044_s1 + $0x10] sm:$0xff]  ;;  %v85_v14 = vld [vmem:[%s3044_s1 + $0x8] sm:$0xff] }
   0x6   :  { %1809 = vmatprep.subr.mxu0 %v97_v2  ;;  %1935 = vmatprep.subr.mxu1 %v97_v2  ;;  %v84_v15 = vld [vmem:[%s3044_s1] sm:$0xff]  ;;  %v21_v18 = vld [vmem:[%s3045_s0 + $0x8] sm:$0xff]  ;;  %v22_v20 = vld [vmem:[%s3045_s0 + $0x10] sm:$0xff] }
   0x7   :  { %1810 = vmatpush3.msra.mxu0 %v97_v2  ;;  %1951 = vmatpush3.msra.mxu1 %v97_v2  ;;  %v20_v16 = vld [vmem:[%s3045_s0] sm:$0xff]  ;;  %v53_v19 = vld [vmem:[%s3045_s0 + $0x108] sm:$0xff]  ;;  %v54_v21 = vld [vmem:[%s3045_s0 + $0x110] sm:$0xff] }
   0x8   :  { %1811 = vmatprep.subr.mxu0 %v96_v3  ;;  %1936 = vmatprep.subr.mxu1 %v96_v3  ;;  %v52_v17 = vld [vmem:[%s3045_s0 + $0x100] sm:$0xff]  ;;  %v23_v22 = vld [vmem:[%s3045_s0 + $0x18] sm:$0xff]  ;;  %v25_v26 = vld [vmem:[%s3045_s0 + $0x28] sm:$0xff] }
   0x9   :  { %1812 = vmatpush3.msra.mxu0 %v96_v3  ;;  %1952 = vmatpush3.msra.mxu1 %v96_v3  ;;  %v55_v23 = vld [vmem:[%s3045_s0 + $0x118] sm:$0xff]  ;;  %v24_v24 = vld [vmem:[%s3045_s0 + $0x20] sm:$0xff]  ;;  %v57_v27 = vld [vmem:[%s3045_s0 + $0x128] sm:$0xff] }
   0xa   :  { %1813 = vmatprep.subr.mxu0 %v95_v4  ;;  %1937 = vmatprep.subr.mxu1 %v95_v4  ;;  %v56_v25 = vld [vmem:[%s3045_s0 + $0x120] sm:$0xff]  ;;  %v26_v28 = vld [vmem:[%s3045_s0 + $0x30] sm:$0xff]  ;;  %v27_v30 = vld [vmem:[%s3045_s0 + $0x38] sm:$0xff] }
   0xb   :  { %1814 = vmatpush3.msra.mxu0 %v95_v4  ;;  %1953 = vmatpush3.msra.mxu1 %v95_v4  ;;  %v58_v29 = vld [vmem:[%s3045_s0 + $0x130] sm:$0xff]  ;;  %v59_v31 = vld [vmem:[%s3045_s0 + $0x138] sm:$0xff]  ;;  %v28_v32 = vld [vmem:[%s3045_s0 + $0x40] sm:$0xff] }
   0xc   :  { %1815 = vmatprep.subr.mxu0 %v94_v5  ;;  %1938 = vmatprep.subr.mxu1 %v94_v5  ;;  %v60_v33 = vld [vmem:[%s3045_s0 + $0x140] sm:$0xff]  ;;  %v29_v34 = vld [vmem:[%s3045_s0 + $0x48] sm:$0xff]  ;;  %v30_v36 = vld [vmem:[%s3045_s0 + $0x50] sm:$0xff] }
   0xd   :  { %1816 = vmatpush3.msra.mxu0 %v94_v5  ;;  %1954 = vmatpush3.msra.mxu1 %v94_v5  ;;  %v61_v35 = vld [vmem:[%s3045_s0 + $0x148] sm:$0xff]  ;;  %v62_v37 = vld [vmem:[%s3045_s0 + $0x150] sm:$0xff]  ;;  %v31_v38 = vld [vmem:[%s3045_s0 + $0x58] sm:$0xff] }
   0xe   :  { %1817 = vmatprep.subr.mxu0 %v93_v6  ;;  %1939 = vmatprep.subr.mxu1 %v93_v6  ;;  %v63_v39 = vld [vmem:[%s3045_s0 + $0x158] sm:$0xff]  ;;  %v32_v40 = vld [vmem:[%s3045_s0 + $0x60] sm:$0xff]  ;;  %v33_v42 = vld [vmem:[%s3045_s0 + $0x68] sm:$0xff] }
   0xf   :  { %1818 = vmatpush3.msra.mxu0 %v93_v6  ;;  %1955 = vmatpush3.msra.mxu1 %v93_v6  ;;  %v64_v41 = vld [vmem:[%s3045_s0 + $0x160] sm:$0xff]  ;;  %v65_v43 = vld [vmem:[%s3045_s0 + $0x168] sm:$0xff]  ;;  %v34_v44 = vld [vmem:[%s3045_s0 + $0x70] sm:$0xff] }
  0x10   :  { %1819 = vmatprep.subr.mxu0 %v92_v7  ;;  %1940 = vmatprep.subr.mxu1 %v92_v7  ;;  %v66_v45 = vld [vmem:[%s3045_s0 + $0x170] sm:$0xff]  ;;  %v35_v46 = vld [vmem:[%s3045_s0 + $0x78] sm:$0xff]  ;;  %v36_v48 = vld [vmem:[%s3045_s0 + $0x80] sm:$0xff] }
  0x11   :  { %1820 = vmatpush3.msra.mxu0 %v92_v7  ;;  %1956 = vmatpush3.msra.mxu1 %v92_v7  ;;  %v67_v47 = vld [vmem:[%s3045_s0 + $0x178] sm:$0xff]  ;;  %v68_v49 = vld [vmem:[%s3045_s0 + $0x180] sm:$0xff]  ;;  %v37_v50 = vld [vmem:[%s3045_s0 + $0x88] sm:$0xff] }
  0x12   :  { %1821 = vmatprep.subr.mxu0 %v91_v8  ;;  %1941 = vmatprep.subr.mxu1 %v91_v8  ;;  %v69_v51 = vld [vmem:[%s3045_s0 + $0x188] sm:$0xff]  ;;  %v38_v52 = vld [vmem:[%s3045_s0 + $0x90] sm:$0xff]  ;;  %v39_v54 = vld [vmem:[%s3045_s0 + $0x98] sm:$0xff] }
  0x13   :  { %1822 = vmatpush3.msra.mxu0 %v91_v8  ;;  %1957 = vmatpush3.msra.mxu1 %v91_v8  ;;  %v70_v53 = vld [vmem:[%s3045_s0 + $0x190] sm:$0xff]  ;;  %v71_v55 = vld [vmem:[%s3045_s0 + $0x198] sm:$0xff]  ;;  %v40_v56 = vld [vmem:[%s3045_s0 + $0xa0] sm:$0xff] }
  0x14   :  { %1823 = vmatprep.subr.mxu0 %v90_v9  ;;  %1942 = vmatprep.subr.mxu1 %v90_v9  ;;  %v72_v57 = vld [vmem:[%s3045_s0 + $0x1a0] sm:$0xff]  ;;  %v41_v58 = vld [vmem:[%s3045_s0 + $0xa8] sm:$0xff]  ;;  %v42_v60 = vld [vmem:[%s3045_s0 + $0xb0] sm:$0xff] }
  0x15   :  { %1824 = vmatpush3.msra.mxu0 %v90_v9  ;;  %1958 = vmatpush3.msra.mxu1 %v90_v9  ;;  %v73_v59 = vld [vmem:[%s3045_s0 + $0x1a8] sm:$0xff]  ;;  %v74_v61 = vld [vmem:[%s3045_s0 + $0x1b0] sm:$0xff]  ;;  %v43_v62 = vld [vmem:[%s3045_s0 + $0xb8] sm:$0xff] }
  0x16   :  { %1825 = vmatprep.subr.mxu0 %v89_v10  ;;  %1943 = vmatprep.subr.mxu1 %v89_v10  ;;  %v75_v63 = vld [vmem:[%s3045_s0 + $0x1b8] sm:$0xff]  ;;  %v44_v0 = vld [vmem:[%s3045_s0 + $0xc0] sm:$0xff]  ;;  %v45_v2 = vld [vmem:[%s3045_s0 + $0xc8] sm:$0xff] }
  0x17   :  { %1826 = vmatpush3.msra.mxu0 %v89_v10  ;;  %1959 = vmatpush3.msra.mxu1 %v89_v10  ;;  %v76_v1 = vld [vmem:[%s3045_s0 + $0x1c0] sm:$0xff]  ;;  %v77_v3 = vld [vmem:[%s3045_s0 + $0x1c8] sm:$0xff]  ;;  %v46_v4 = vld [vmem:[%s3045_s0 + $0xd0] sm:$0xff] }
  0x18   :  { %1827 = vmatprep.subr.mxu0 %v88_v11  ;;  %1944 = vmatprep.subr.mxu1 %v88_v11  ;;  %v78_v5 = vld [vmem:[%s3045_s0 + $0x1d0] sm:$0xff]  ;;  %v47_v6 = vld [vmem:[%s3045_s0 + $0xd8] sm:$0xff]  ;;  %v48_v8 = vld [vmem:[%s3045_s0 + $0xe0] sm:$0xff] }
  0x19   :  { %1828 = vmatpush3.msra.mxu0 %v88_v11  ;;  %1960 = vmatpush3.msra.mxu1 %v88_v11  ;;  %v79_v7 = vld [vmem:[%s3045_s0 + $0x1d8] sm:$0xff]  ;;  %v80_v9 = vld [vmem:[%s3045_s0 + $0x1e0] sm:$0xff]  ;;  %v49_v10 = vld [vmem:[%s3045_s0 + $0xe8] sm:$0xff] }
  0x1a   :  { %1829 = vmatprep.subr.mxu0 %v87_v12  ;;  %1945 = vmatprep.subr.mxu1 %v87_v12  ;;  %v81_v11 = vld [vmem:[%s3045_s0 + $0x1e8] sm:$0xff] }
  0x1b   :  { %1830 = vmatpush3.msra.mxu0 %v87_v12  ;;  %1961 = vmatpush3.msra.mxu1 %v87_v12  ;;  %v50_v12 = vld [vmem:[%s3045_s0 + $0xf0] sm:$0xff] }
  0x1c   :  { %1831 = vmatprep.subr.mxu0 %v86_v13  ;;  %1946 = vmatprep.subr.mxu1 %v86_v13 }
  0x1d   :  { %1832 = vmatpush3.msra.mxu0 %v86_v13  ;;  %1962 = vmatpush3.msra.mxu1 %v86_v13  ;;  %v82_v13 = vld [vmem:[%s3045_s0 + $0x1f0] sm:$0xff] }
  0x1e   :  { %1833 = vmatprep.subr.mxu0 %v85_v14  ;;  %1947 = vmatprep.subr.mxu1 %v85_v14 }
  0x1f   :  { %1834 = vmatpush3.msra.mxu0 %v85_v14  ;;  %1963 = vmatpush3.msra.mxu1 %v85_v14  ;;  %v51_v14 = vld [vmem:[%s3045_s0 + $0xf8] sm:$0xff] }
  0x20   :  { %1835 = vmatprep.subr.mxu0 %v84_v15  ;;  %1948 = vmatprep.subr.mxu1 %v84_v15 }
  0x21   :  { %1836 = vmatpush3.msra.mxu0 %v84_v15  ;;  %1964 = vmatpush3.msra.mxu1 %v84_v15  ;;  %v83_v15 = vld [vmem:[%s3045_s0 + $0x1f8] sm:$0xff] }
  0x22   :  { %1837 = vmatprep.mubr.f32.mxu0 %v20_v16  ;;  %1885 = vmatprep.mubr.f32.mxu1 %v52_v17 }
  0x23   :  { %1838 = vmatmul.mubr.f32.vlgmr.msra.gmra.mxu0 %v21_v18  ;;  %1886 = vmatmul.mubr.f32.vlgmr.msra.gmra.mxu1 %v53_v19 }
  0x24   :  { %1840 = vmatprep.mubr.f32.mxu0 %v22_v20  ;;  %1888 = vmatprep.mubr.f32.mxu1 %v54_v21 }
  0x27   :  { %1841 = vmatmul.mubr.f32.gmra.mxu0 %v23_v22  ;;  %1889 = vmatmul.mubr.f32.gmra.mxu1 %v55_v23 }
  0x28   :  { %1843 = vmatprep.mubr.f32.mxu0 %v24_v24  ;;  %1891 = vmatprep.mubr.f32.mxu1 %v56_v25 }
  0x2b   :  { %1844 = vmatmul.mubr.f32.gmra.mxu0 %v25_v26  ;;  %1892 = vmatmul.mubr.f32.gmra.mxu1 %v57_v27 }
  0x2c   :  { %1846 = vmatprep.mubr.f32.mxu0 %v26_v28  ;;  %1894 = vmatprep.mubr.f32.mxu1 %v58_v29 }
  0x2f   :  { %1847 = vmatmul.mubr.f32.gmra.mxu0 %v27_v30  ;;  %1895 = vmatmul.mubr.f32.gmra.mxu1 %v59_v31 }
  0x30   :  { %1849 = vmatprep.mubr.f32.mxu0 %v28_v32  ;;  %1897 = vmatprep.mubr.f32.mxu1 %v60_v33 }
  0x33   :  { %1850 = vmatmul.mubr.f32.gmra.mxu0 %v29_v34  ;;  %1898 = vmatmul.mubr.f32.gmra.mxu1 %v61_v35 }
  0x34   :  { %1852 = vmatprep.mubr.f32.mxu0 %v30_v36  ;;  %1900 = vmatprep.mubr.f32.mxu1 %v62_v37 }
  0x37   :  { %1853 = vmatmul.mubr.f32.gmra.mxu0 %v31_v38  ;;  %1901 = vmatmul.mubr.f32.gmra.mxu1 %v63_v39 }
  0x38   :  { %1855 = vmatprep.mubr.f32.mxu0 %v32_v40  ;;  %1903 = vmatprep.mubr.f32.mxu1 %v64_v41 }
  0x3b   :  { %1856 = vmatmul.mubr.f32.gmra.mxu0 %v33_v42  ;;  %1904 = vmatmul.mubr.f32.gmra.mxu1 %v65_v43 }
  0x3c   :  { %1858 = vmatprep.mubr.f32.mxu0 %v34_v44  ;;  %1906 = vmatprep.mubr.f32.mxu1 %v66_v45 }
  0x3f   :  { %1859 = vmatmul.mubr.f32.gmra.mxu0 %v35_v46  ;;  %1907 = vmatmul.mubr.f32.gmra.mxu1 %v67_v47 }
  0x40   :  { %1861 = vmatprep.mubr.f32.mxu0 %v36_v48  ;;  %1909 = vmatprep.mubr.f32.mxu1 %v68_v49 }
  0x43   :  { %1862 = vmatmul.mubr.f32.gmra.mxu0 %v37_v50  ;;  %1910 = vmatmul.mubr.f32.gmra.mxu1 %v69_v51 }
  0x44   :  { %1864 = vmatprep.mubr.f32.mxu0 %v38_v52  ;;  %1912 = vmatprep.mubr.f32.mxu1 %v70_v53 }
  0x47   :  { %1865 = vmatmul.mubr.f32.gmra.mxu0 %v39_v54  ;;  %1913 = vmatmul.mubr.f32.gmra.mxu1 %v71_v55 }
  0x48   :  { %1867 = vmatprep.mubr.f32.mxu0 %v40_v56  ;;  %1915 = vmatprep.mubr.f32.mxu1 %v72_v57 }
  0x4b   :  { %1868 = vmatmul.mubr.f32.gmra.mxu0 %v41_v58  ;;  %1916 = vmatmul.mubr.f32.gmra.mxu1 %v73_v59 }
  0x4c   :  { %1870 = vmatprep.mubr.f32.mxu0 %v42_v60  ;;  %1918 = vmatprep.mubr.f32.mxu1 %v74_v61 }
  0x4f   :  { %1871 = vmatmul.mubr.f32.gmra.mxu0 %v43_v62  ;;  %1919 = vmatmul.mubr.f32.gmra.mxu1 %v75_v63 }
  0x50   :  { %1873 = vmatprep.mubr.f32.mxu0 %v44_v0  ;;  %1921 = vmatprep.mubr.f32.mxu1 %v76_v1 }
  0x53   :  { %1874 = vmatmul.mubr.f32.gmra.mxu0 %v45_v2  ;;  %1922 = vmatmul.mubr.f32.gmra.mxu1 %v77_v3 }
  0x54   :  { %1876 = vmatprep.mubr.f32.mxu0 %v46_v4  ;;  %1924 = vmatprep.mubr.f32.mxu1 %v78_v5 }
  0x57   :  { %1877 = vmatmul.mubr.f32.gmra.mxu0 %v47_v6  ;;  %1925 = vmatmul.mubr.f32.gmra.mxu1 %v79_v7 }
  0x58   :  { %1879 = vmatprep.mubr.f32.mxu0 %v48_v8  ;;  %1927 = vmatprep.mubr.f32.mxu1 %v80_v9 }
  0x5b   :  { %1880 = vmatmul.mubr.f32.gmra.mxu0 %v49_v10  ;;  %1928 = vmatmul.mubr.f32.gmra.mxu1 %v81_v11 }
  0x5c   :  { %1882 = vmatprep.mubr.f32.mxu0 %v50_v12  ;;  %1930 = vmatprep.mubr.f32.mxu1 %v82_v13 }
  0x5f   :  { %1883 = vmatmul.mubr.f32.gmra.mxu0 %v51_v14  ;;  %1931 = vmatmul.mubr.f32.gmra.mxu1 %v83_v15 }
  0xe3   :  { %v1839_v16 = vpop.f32.mrf.mxu0  ;;  %v1887_v17 = vpop.f32.mrf.mxu1 }
  0xe5   :  { %v166_v18 = vpop.f32.mrf.mxu0  ;;  %v326_v20 = vpop.f32.mrf.mxu1 }
  0xe7   :  { %v1842_v19 = vpop.f32.mrf.mxu0  ;;  %v1890_v26 = vpop.f32.mrf.mxu1 }
  0xe8   :  { %v486_v21 = vmax.f32 %v1839_v16, %v1842_v19  ;;  %v488_v27 = vmax.f32 %v1887_v17, %v1890_v26 }
  0xe9   :  { %v176_v44 = vpop.f32.mrf.mxu0  ;;  %v336_v45 = vpop.f32.mrf.mxu1 }
  0xea   :  { %v969_v22 = vsel %vm517_vm0, %v486_v21, -inf  ;;  %v1081_v23 = vsel %vm630_vm1, %v486_v21, -inf  ;;  %v1193_v24 = vsel %vm743_vm2, %v486_v21, -inf  ;;  %v1305_v25 = vsel %vm856_vm3, %v486_v21, -inf }
  0xeb   :  { %v970_v28 = vrot.slane %v969_v22, 4  ;;  %v1082_v29 = vrot.slane %v1081_v23, 4  ;;  %v1194_v30 = vrot.slane %v1193_v24, 4  ;;  %v1306_v31 = vrot.slane %v1305_v25, 4  ;;  %v1845_v60 = vpop.f32.mrf.mxu0 }
  0xec   :  { %v1025_v32 = vsel %vm517_vm0, %v488_v27, -inf  ;;  %v1137_v33 = vsel %vm630_vm1, %v488_v27, -inf  ;;  %v1249_v34 = vsel %vm743_vm2, %v488_v27, -inf  ;;  %v1361_v35 = vsel %vm856_vm3, %v488_v27, -inf }
  0xed   :  { %v971_v36 = vmax.f32 %v969_v22, %v970_v28  ;;  %v2246_v37 = vmax.f32 %v1081_v23, %v1082_v29  ;;  %v2248_v38 = vmax.f32 %v1193_v24, %v1194_v30  ;;  %v2250_v39 = vmax.f32 %v1305_v25, %v1306_v31  ;;  %v2271_v13 = vpop.f32.mrf.mxu0 }
  0xee   :  { %v1026_v40 = vrot.slane %v1025_v32, 4  ;;  %v1138_v41 = vrot.slane %v1137_v33, 4  ;;  %v1250_v42 = vrot.slane %v1249_v34, 4  ;;  %v1362_v43 = vrot.slane %v1361_v35, 4 }
  0xef   :  { %v972_v46 = vrot.slane %v971_v36, 2  ;;  %v1084_v47 = vrot.slane %v2246_v37, 2  ;;  %v1196_v48 = vrot.slane %v2248_v38, 2  ;;  %v1308_v49 = vrot.slane %v2250_v39, 2  ;;  %v1848_v30 = vpop.f32.mrf.mxu0 }
  0xf0   :  { %v485_v50 = vmax.f32 %v166_v18, %v176_v44  ;;  %v487_v51 = vmax.f32 %v326_v20, %v336_v45  ;;  %v2255_v52 = vmax.f32 %v1025_v32, %v1026_v40  ;;  %v2257_v53 = vmax.f32 %v1137_v33, %v1138_v41 }
  0xf1   :  { %v2259_v54 = vmax.f32 %v1249_v34, %v1250_v42  ;;  %v2261_v55 = vmax.f32 %v1361_v35, %v1362_v43  ;;  %v973_v31 = vmax.f32 %v971_v36, %v972_v46  ;;  %v1085_v36 = vmax.f32 %v2246_v37, %v1084_v47 }
  0xf2   :  { %v518_v56 = vsel %vm517_vm0, %v485_v50, -inf  ;;  %v631_v57 = vsel %vm630_vm1, %v485_v50, -inf  ;;  %v744_v58 = vsel %vm743_vm2, %v485_v50, -inf  ;;  %v857_v59 = vsel %vm856_vm3, %v485_v50, -inf }
  0xf3   :  { %v519_v61 = vrot.slane %v518_v56, 4  ;;  %v632_v62 = vrot.slane %v631_v57, 4  ;;  %v745_v63 = vrot.slane %v744_v58, 4  ;;  %v858_v0 = vrot.slane %v857_v59, 4 }
  0xf4   :  { %v574_v1 = vsel %vm517_vm0, %v487_v51, -inf  ;;  %v687_v2 = vsel %vm630_vm1, %v487_v51, -inf  ;;  %v800_v3 = vsel %vm743_vm2, %v487_v51, -inf  ;;  %v913_v4 = vsel %vm856_vm3, %v487_v51, -inf }
  0xf5   :  { %v520_v5 = vmax.f32 %v518_v56, %v519_v61  ;;  %v633_v6 = vmax.f32 %v631_v57, %v632_v62  ;;  %v746_v7 = vmax.f32 %v744_v58, %v745_v63  ;;  %v859_v8 = vmax.f32 %v857_v59, %v858_v0 }
  0xf6   :  { %v575_v9 = vrot.slane %v574_v1, 4  ;;  %v688_v10 = vrot.slane %v687_v2, 4  ;;  %v801_v11 = vrot.slane %v800_v3, 4  ;;  %v914_v12 = vrot.slane %v913_v4, 4 }
  0xf7   :  { %v521_v14 = vrot.slane %v520_v5, 2  ;;  %v634_v15 = vrot.slane %v633_v6, 2  ;;  %v747_v16 = vrot.slane %v746_v7, 2  ;;  %v860_v17 = vrot.slane %v859_v8, 2 }
  0xf8   :  { %v576_v18 = vmax.f32 %v574_v1, %v575_v9  ;;  %v689_v19 = vmax.f32 %v687_v2, %v688_v10  ;;  %v802_v20 = vmax.f32 %v800_v3, %v801_v11  ;;  %v915_v21 = vmax.f32 %v913_v4, %v914_v12 }
  0xf9   :  { %v522_v22 = vmax.f32 %v520_v5, %v521_v14  ;;  %v635_v23 = vmax.f32 %v633_v6, %v634_v15  ;;  %v748_v24 = vmax.f32 %v746_v7, %v747_v16  ;;  %v861_v25 = vmax.f32 %v859_v8, %v860_v17  ;;  %v1893_v7 = vpop.f32.mrf.mxu1 }
  0xfa   :  { %v577_v26 = vrot.slane %v576_v18, 2  ;;  %v690_v27 = vrot.slane %v689_v19, 2  ;;  %v803_v28 = vrot.slane %v802_v20, 2  ;;  %v916_v29 = vrot.slane %v915_v21, 2 }
  0xfb   :  { %v523_v32 = vrot.slane %v522_v22, 1  ;;  %v636_v33 = vrot.slane %v635_v23, 1  ;;  %v749_v34 = vrot.slane %v748_v24, 1  ;;  %v1028_v35 = vrot.slane %v2255_v52, 2 }
  0xfc   :  { %v578_v40 = vmax.f32 %v576_v18, %v577_v26  ;;  %v691_v41 = vmax.f32 %v689_v19, %v690_v27  ;;  %v804_v42 = vmax.f32 %v802_v20, %v803_v28  ;;  %v490_v50 = vmax.f32 %v1845_v60, %v1848_v30  ;;  %v346_v19 = vpop.f32.mrf.mxu1 }
  0xfd   :  { %v524_v43 = vmax.f32 %v522_v22, %v523_v32  ;;  %v637_v44 = vmax.f32 %v635_v23, %v636_v33  ;;  %v750_v45 = vmax.f32 %v748_v24, %v749_v34  ;;  %v862_v51 = vrot.slane %v861_v25, 1 }
  0xfe   :  { %v579_v56 = vrot.slane %v578_v40, 1  ;;  %v692_v57 = vrot.slane %v691_v41, 1  ;;  %v917_v58 = vmax.f32 %v915_v21, %v916_v29  ;;  %v1140_v46 = vrot.slane %v2257_v53, 2  ;;  %v196_v29 = vpop.f32.mrf.mxu0  ;;  %v1896_v32 = vpop.f32.mrf.mxu1 }
  0xff   :  { %v1418_v59 = vsel %vm1417_vm4, %v524_v43, %v637_v44  ;;  %v805_v61 = vrot.slane %v804_v42, 1  ;;  %v974_v62 = vrot.slane %v973_v31, 1  ;;  %v1197_v63 = vmax.f32 %v2248_v38, %v1196_v48 }
 0x100   :  { %v580_v0 = vmax.f32 %v578_v40, %v579_v56  ;;  %v693_v60 = vmax.f32 %v691_v41, %v692_v57  ;;  %v1029_v1 = vmax.f32 %v2255_v52, %v1028_v35  ;;  %v1434_v2 = vsel %vm517_vm0, %v1418_v59, %v750_v45  ;;  %v1851_v45 = vpop.f32.mrf.mxu0 }
 0x101   :  { %v976_v3 = vsel %vm517_vm0, %v490_v50, -inf  ;;  %v1088_v37 = vsel %vm630_vm1, %v490_v50, -inf  ;;  %v1252_v47 = vrot.slane %v2259_v54, 2  ;;  %v1364_v4 = vrot.slane %v2261_v55, 2 }
 0x102   :  { %v863_v5 = vmax.f32 %v861_v25, %v862_v51  ;;  %v918_v6 = vrot.slane %v917_v58, 1  ;;  %v1086_v8 = vrot.slane %v1085_v36, 1  ;;  %v1141_v38 = vmax.f32 %v2257_v53, %v1140_v46 }
 0x103   :  { %v806_v48 = vmax.f32 %v804_v42, %v805_v61  ;;  %v1200_v9 = vsel %vm743_vm2, %v490_v50, -inf  ;;  %v1426_v10 = vsel %vm1417_vm4, %v580_v0, %v693_v60  ;;  %v977_v11 = vrot.slane %v976_v3, 4 }
 0x104   :  { %v1451_v52 = vsel %vm1450_vm5, %v1434_v2, %v863_v5  ;;  %v1089_v12 = vrot.slane %v1088_v37, 4  ;;  %v975_v14 = vmax.f32 %v973_v31, %v974_v62  ;;  %v1309_v15 = vmax.f32 %v2250_v39, %v1308_v49 }
 0x105   :  { %v1030_v16 = vrot.slane %v1029_v1, 1  ;;  %v1198_v17 = vrot.slane %v1197_v63, 1  ;;  %v1253_v18 = vmax.f32 %v2259_v54, %v1252_v47  ;;  %v919_v53 = vmax.f32 %v917_v58, %v918_v6  ;;  %v356_v58 = vpop.f32.mrf.mxu1 }
 0x106   :  { %v1201_v20 = vrot.slane %v1200_v9, 4  ;;  %v1365_v21 = vmax.f32 %v2261_v55, %v1364_v4  ;;  %v1468_v22 = vsel %vm1467_vm6, %v1451_v52, %v975_v14  ;;  %v1442_v23 = vsel %vm517_vm0, %v1426_v10, %v806_v48 }
 0x107   :  { %v1312_v24 = vsel %vm856_vm3, %v490_v50, -inf  ;;  %v1087_v25 = vmax.f32 %v1085_v36, %v1086_v8  ;;  %v1142_v26 = vrot.slane %v1141_v38, 1  ;;  %v978_v27 = vmax.f32 %v976_v3, %v977_v11 }
 0x108   :  { %v1090_v39 = vmax.f32 %v1088_v37, %v1089_v12  ;;  %v1310_v49 = vrot.slane %v1309_v15, 1  ;;  %v1031_v28 = vmax.f32 %v1029_v1, %v1030_v16  ;;  %v1459_v30 = vsel %vm1450_vm5, %v1442_v23, %v919_v53  ;;  %v2324_v37 = vpop.f32.mrf.mxu0 }
 0x109   :  { %v1485_v54 = vsel %vm1484_vm7, %v1468_v22, %v1087_v25  ;;  %v1202_v31 = vmax.f32 %v1200_v9, %v1201_v20  ;;  %v1313_v55 = vrot.slane %v1312_v24, 4  ;;  %v1199_v33 = vmax.f32 %v1197_v63, %v1198_v17 }
 0x10a   :  { %v1254_v34 = vrot.slane %v1253_v18, 1  ;;  %v1366_v35 = vrot.slane %v1365_v21, 1  ;;  %v1143_v40 = vmax.f32 %v1141_v38, %v1142_v26  ;;  %v979_v41 = vrot.slane %v978_v27, 2  ;;  %v1854_v16 = vpop.f32.mrf.mxu0 }
 0x10b   :  { %v1091_v42 = vrot.slane %v1090_v39, 2  ;;  %v1502_v43 = vsel %vm1501_vm8, %v1485_v54, %v1199_v33  ;;  %v1476_v44 = vsel %vm1467_vm6, %v1459_v30, %v1031_v28  ;;  %v1311_v50 = vmax.f32 %v1309_v15, %v1310_v49 }
 0x10c   :  { %v1203_v51 = vrot.slane %v1202_v31, 2  ;;  %v2304_v56 = vmax.f32 %v1312_v24, %v1313_v55  ;;  %v492_v57 = vmax.f32 %v1893_v7, %v1896_v32  ;;  %v2306_v36 = vmax.f32 %v1253_v18, %v1254_v34 }
 0x10d   :  { %v2308_v46 = vmax.f32 %v1365_v21, %v1366_v35  ;;  %v489_v59 = vmax.f32 %v2271_v13, %v196_v29  ;;  %v2312_v61 = vsel %vm1518_vm9, %v1502_v43, %v1311_v50  ;;  %v2315_v62 = vsel %vm1484_vm7, %v1476_v44, %v1143_v40 }
 0x10e   :  { %v2317_v63 = vmax.f32 %v978_v27, %v979_v41  ;;  %v2319_v0 = vmax.f32 %v1090_v39, %v1091_v42  ;;  %v491_v3 = vmax.f32 %v346_v19, %v356_v58  ;;  %v2326_v13 = vmax.f32 %v1202_v31, %v1203_v51 }
 0x10f   :  { %v525_v60 = vsel %vm517_vm0, %v489_v59, -inf  ;;  %v638_v1 = vsel %vm630_vm1, %v489_v59, -inf  ;;  %v751_v2 = vsel %vm743_vm2, %v489_v59, -inf  ;;  %v1315_v47 = vrot.slane %v2304_v56, 2 }
 0x110   :  { %v1032_v4 = vsel %vm517_vm0, %v492_v57, -inf  ;;  %v526_v5 = vrot.slane %v525_v60, 4  ;;  %v1144_v6 = vsel %vm630_vm1, %v492_v57, -inf  ;;  %v639_v7 = vrot.slane %v638_v1, 4 }
 0x111   :  { %v752_v8 = vrot.slane %v751_v2, 4  ;;  %v864_v38 = vsel %vm856_vm3, %v489_v59, -inf  ;;  %v981_v48 = vrot.slane %v2317_v63, 1  ;;  %v1093_v9 = vrot.slane %v2319_v0, 1 }
 0x112   :  { %v1256_v52 = vsel %vm743_vm2, %v492_v57, -inf  ;;  %v527_v10 = vmax.f32 %v525_v60, %v526_v5  ;;  %v640_v11 = vmax.f32 %v638_v1, %v639_v7  ;;  %v865_v14 = vrot.slane %v864_v38, 4  ;;  %v2347_v1 = vld [vmem:[%s3046_s2] ss:$0 sm:$0xff] }
 0x113   :  { %v753_v12 = vmax.f32 %v751_v2, %v752_v8  ;;  %v581_v15 = vsel %vm517_vm0, %v491_v3, -inf  ;;  %v1033_v17 = vrot.slane %v1032_v4, 4  ;;  %v1145_v18 = vrot.slane %v1144_v6, 4 }
 0x114   :  { %v1368_v53 = vsel %vm856_vm3, %v492_v57, -inf  ;;  %v528_v19 = vrot.slane %v527_v10, 2  ;;  %v641_v20 = vrot.slane %v640_v11, 2  ;;  %v866_v22 = vmax.f32 %v864_v38, %v865_v14 }
 0x115   :  { %v754_v21 = vrot.slane %v753_v12, 2  ;;  %v582_v23 = vrot.slane %v581_v15, 4  ;;  %v1257_v24 = vrot.slane %v1256_v52, 4  ;;  %v694_v26 = vsel %vm630_vm1, %v491_v3, -inf }
 0x116   :  { %v529_v25 = vmax.f32 %v527_v10, %v528_v19  ;;  %v2338_v27 = vmax.f32 %v1851_v45, %v1854_v16  ;;  %v642_v39 = vmax.f32 %v640_v11, %v641_v20  ;;  %v867_v28 = vrot.slane %v866_v22, 2 }
 0x117   :  { %v755_v49 = vmax.f32 %v753_v12, %v754_v21  ;;  %v583_v29 = vmax.f32 %v581_v15, %v582_v23  ;;  %v695_v30 = vrot.slane %v694_v26, 4  ;;  %v807_v31 = vsel %vm743_vm2, %v491_v3, -inf }
 0x118   :  { %v530_v54 = vrot.slane %v529_v25, 1  ;;  %v920_v55 = vsel %vm856_vm3, %v491_v3, -inf  ;;  %v643_v32 = vrot.slane %v642_v39, 1  ;;  %v868_v34 = vmax.f32 %v866_v22, %v867_v28 }
 0x119   :  { %v756_v33 = vrot.slane %v755_v49, 1  ;;  %v584_v35 = vrot.slane %v583_v29, 2  ;;  %v696_v41 = vmax.f32 %v694_v26, %v695_v30  ;;  %v808_v42 = vrot.slane %v807_v31, 4 }
 0x11a   :  { %v531_v40 = vmax.f32 %v529_v25, %v530_v54  ;;  %v921_v43 = vrot.slane %v920_v55, 4  ;;  %v1369_v44 = vrot.slane %v1368_v53, 4  ;;  %v644_v45 = vmax.f32 %v642_v39, %v643_v32 }
 0x11b   :  { %v757_v50 = vmax.f32 %v755_v49, %v756_v33  ;;  %v869_v51 = vrot.slane %v868_v34, 1  ;;  %v697_v57 = vrot.slane %v696_v41, 2  ;;  %v809_v58 = vmax.f32 %v807_v31, %v808_v42 }
 0x11c   :  { %v922_v59 = vmax.f32 %v920_v55, %v921_v43  ;;  %v983_v60 = vsel %vm517_vm0, %v2338_v27, -inf  ;;  %v1316_v2 = vmax.f32 %v2304_v56, %v1315_v47  ;;  %v1419_v5 = vsel %vm1417_vm4, %v531_v40, %v644_v45 }
 0x11d   :  { %v870_v3 = vmax.f32 %v868_v34, %v869_v51  ;;  %v984_v7 = vrot.slane %v983_v60, 4  ;;  %v1435_v8 = vsel %vm517_vm0, %v1419_v5, %v757_v50  ;;  %v585_v38 = vmax.f32 %v583_v29, %v584_v35 }
 0x11e   :  { %v698_v10 = vmax.f32 %v696_v41, %v697_v57  ;;  %v810_v11 = vrot.slane %v809_v58, 2  ;;  %v982_v12 = vmax.f32 %v2317_v63, %v981_v48  ;;  %v1034_v14 = vmax.f32 %v1032_v4, %v1033_v17 }
 0x11f   :  { %v1146_v15 = vmax.f32 %v1144_v6, %v1145_v18  ;;  %v1452_v16 = vsel %vm1450_vm5, %v1435_v8, %v870_v3  ;;  %v1542_v19 = vadd.f32 %v2347_v1, %v2312_v61  ;;  %v1258_v20 = vmax.f32 %v1256_v52, %v1257_v24  ;;  %v1899_v18 = vpop.f32.mrf.mxu1 }
 0x120   :  { %v1370_v56 = vmax.f32 %v1368_v53, %v1369_v44  ;;  %v923_v47 = vrot.slane %v922_v59, 2  ;;  %v1205_v21 = vrot.slane %v2326_v13, 1  ;;  %v1469_v22 = vsel %vm1467_vm6, %v1452_v16, %v982_v12 }
 0x121   :  { %v811_v23 = vmax.f32 %v809_v58, %v810_v11  ;;  %v985_v25 = vmax.f32 %v983_v60, %v984_v7  ;;  %v1510_v63 = vsel %vm1501_vm8, %v2315_v62, %v2306_v36  ;;  %v1094_v4 = vmax.f32 %v2319_v0, %v1093_v9  ;;  %v366_v34 = vpop.f32.mrf.mxu1  ;;  %v216_v7 = vpop.f32.mrf.mxu0 }
 0x122   :  { %v586_v6 = vrot.slane %v585_v38, 1  ;;  %v699_v48 = vrot.slane %v698_v10, 1  ;;  %v1317_v61 = vrot.slane %v1316_v2, 1  ;;  %v1035_v52 = vrot.slane %v1034_v14, 2 }
 0x123   :  { %v1147_v17 = vrot.slane %v1146_v15, 2  ;;  %v1095_v53 = vsel %vm630_vm1, %v2338_v27, -inf  ;;  %v1259_v24 = vrot.slane %v1258_v20, 2  ;;  %v1371_v26 = vrot.slane %v1370_v56, 2 }
 0x124   :  { %v1486_v39 = vsel %vm1484_vm7, %v1469_v22, %v1094_v4  ;;  %v924_v49 = vmax.f32 %v922_v59, %v923_v47  ;;  %v1558_v28 = vmul.f32 0.1, %v1542_v19  ;;  %v1206_v36 = vmax.f32 %v2326_v13, %v1205_v21  ;;  %v1902_v59 = vpop.f32.mrf.mxu1 }
 0x125   :  { %v812_v62 = vrot.slane %v811_v23, 1  ;;  %v986_v29 = vrot.slane %v985_v25, 2  ;;  %v1527_v0 = vsel %vm1518_vm9, %v1510_v63, %v2308_v46  ;;  %v587_v9 = vmax.f32 %v585_v38, %v586_v6 }
 0x126   :  { %v700_v54 = vmax.f32 %v698_v10, %v699_v48  ;;  %v1096_v30 = vrot.slane %v1095_v53, 4  ;;  %v1318_v31 = vmax.f32 %v1316_v2, %v1317_v61  ;;  %v1036_v55 = vmax.f32 %v1034_v14, %v1035_v52  ;;  %v376_v47 = vpop.f32.mrf.mxu1 }
 0x127   :  { %v1148_v32 = vmax.f32 %v1146_v15, %v1147_v17  ;;  %v1503_v33 = vsel %vm1501_vm8, %v1486_v39, %v1206_v36  ;;  %v1260_v35 = vmax.f32 %v1258_v20, %v1259_v24  ;;  %v1372_v40 = vmax.f32 %v1370_v56, %v1371_v26  ;;  %v1857_v26 = vpop.f32.mrf.mxu0 }
 0x128   :  { %v925_v41 = vrot.slane %v924_v49, 1  ;;  %v1207_v13 = vsel %vm743_vm2, %v2338_v27, -inf  ;;  %v2374_v42 = vadd.f32 %v2347_v1, %v1527_v0  ;;  %v813_v43 = vmax.f32 %v811_v23, %v812_v62 }
 0x129   :  { %v987_v46 = vmax.f32 %v985_v25, %v986_v29  ;;  %v2376_v44 = vmax.f32 %v1542_v19, %v1558_v28  ;;  %v1520_v45 = vsel %vm1518_vm9, %v1503_v33, %v1318_v31  ;;  %v1427_v50 = vsel %vm1417_vm4, %v587_v9, %v700_v54 }
 0x12a   :  { %v1097_v51 = vmax.f32 %v1095_v53, %v1096_v30  ;;  %v1037_v57 = vrot.slane %v1036_v55, 1  ;;  %v1208_v58 = vrot.slane %v1207_v13, 4  ;;  %v1149_v60 = vrot.slane %v1148_v32, 1 }
 0x12b   :  { %v1261_v2 = vrot.slane %v1260_v35, 1  ;;  %v1373_v3 = vrot.slane %v1372_v40, 1  ;;  %v926_v5 = vmax.f32 %v924_v49, %v925_v41  ;;  %v2381_v8 = vadd.f32 %v2347_v1, %v1520_v45 }
 0x12c   :  { %v1443_v38 = vsel %vm517_vm0, %v1427_v50, %v813_v43  ;;  %v988_v10 = vrot.slane %v987_v46, 1  ;;  %v2386_v11 = vmul.f32 %v2376_v44, %v2376_v44  ;;  %v2389_v12 = vmul.f32 0.1, %v2374_v42 }
 0x12d   :  { %v1098_v14 = vrot.slane %v1097_v51, 2  ;;  %v1319_v15 = vsel %vm856_vm3, %v2338_v27, -inf  ;;  %v1038_v16 = vmax.f32 %v1036_v55, %v1037_v57  ;;  %v2393_v19 = vmax.f32 %v1207_v13, %v1208_v58 }
 0x12e   :  { %v496_v20 = vmax.f32 %v1899_v18, %v1902_v59  ;;  %v493_v56 = vmax.f32 %v2324_v37, %v216_v7  ;;  %v1150_v21 = vmax.f32 %v1148_v32, %v1149_v60  ;;  %v2396_v22 = vmax.f32 %v1260_v35, %v1261_v2 }
 0x12f   :  { %v2398_v23 = vmax.f32 %v1372_v40, %v1373_v3  ;;  %v1460_v25 = vsel %vm1450_vm5, %v1443_v38, %v926_v5  ;;  %v2402_v63 = vmul.f32 0.1, %v2381_v8  ;;  %v2404_v4 = vmax.f32 %v987_v46, %v988_v10  ;;  %v2423_v40 = vpop.f32.mrf.mxu0 }
 0x130   :  { %v1320_v27 = vrot.slane %v1319_v15, 4  ;;  %v532_v6 = vsel %vm517_vm0, %v493_v56, -inf  ;;  %v2407_v48 = vmax.f32 %v1097_v51, %v1098_v14  ;;  %v645_v37 = vsel %vm630_vm1, %v493_v56, -inf }
 0x131   :  { %v533_v61 = vrot.slane %v532_v6, 4  ;;  %v495_v52 = vmax.f32 %v366_v34, %v376_v47  ;;  %v1477_v17 = vsel %vm1467_vm6, %v1460_v25, %v1038_v16  ;;  %v1210_v18 = vrot.slane %v2393_v19, 2  ;;  %v1860_v10 = vpop.f32.mrf.mxu0 }
 0x132   :  { %v1039_v53 = vsel %vm517_vm0, %v496_v20, -inf  ;;  %v646_v24 = vrot.slane %v645_v37, 4  ;;  %v1151_v39 = vsel %vm630_vm1, %v496_v20, -inf  ;;  %v758_v28 = vsel %vm743_vm2, %v493_v56, -inf }
 0x133   :  { %v534_v49 = vmax.f32 %v532_v6, %v533_v61  ;;  %v871_v36 = vsel %vm856_vm3, %v493_v56, -inf  ;;  %v2416_v62 = vmax.f32 %v1319_v15, %v1320_v27  ;;  %v1263_v29 = vsel %vm743_vm2, %v496_v20, -inf }
 0x134   :  { %v647_v0 = vmax.f32 %v645_v37, %v646_v24  ;;  %v759_v9 = vrot.slane %v758_v28, 4  ;;  %v2420_v54 = vsel %vm1484_vm7, %v1477_v17, %v1150_v21  ;;  %v872_v31 = vrot.slane %v871_v36, 4 }
 0x135   :  { %v535_v30 = vrot.slane %v534_v49, 2  ;;  %v588_v55 = vsel %vm517_vm0, %v495_v52, -inf  ;;  %v1040_v32 = vrot.slane %v1039_v53, 4  ;;  %v1152_v33 = vrot.slane %v1151_v39, 4 }
 0x136   :  { %v648_v34 = vrot.slane %v647_v0, 2  ;;  %v760_v35 = vmax.f32 %v758_v28, %v759_v9  ;;  %v1264_v41 = vrot.slane %v1263_v29, 4  ;;  %v873_v43 = vmax.f32 %v871_v36, %v872_v31 }
 0x137   :  { %v536_v13 = vmax.f32 %v534_v49, %v535_v30  ;;  %v589_v46 = vrot.slane %v588_v55, 4  ;;  %v1375_v45 = vsel %vm856_vm3, %v496_v20, -inf  ;;  %v701_v57 = vsel %vm630_vm1, %v495_v52, -inf }
 0x138   :  { %v649_v50 = vmax.f32 %v647_v0, %v648_v34  ;;  %v761_v51 = vrot.slane %v760_v35, 2  ;;  %v874_v59 = vrot.slane %v873_v43, 2  ;;  %v702_v2 = vrot.slane %v701_v57, 4 }
 0x139   :  { %v537_v58 = vrot.slane %v536_v13, 1  ;;  %v590_v60 = vmax.f32 %v588_v55, %v589_v46  ;;  %v814_v7 = vsel %vm743_vm2, %v495_v52, -inf  ;;  %v927_v38 = vsel %vm856_vm3, %v495_v52, -inf }
 0x13a   :  { %v650_v3 = vrot.slane %v649_v50, 1  ;;  %v762_v5 = vmax.f32 %v760_v35, %v761_v51  ;;  %v875_v15 = vmax.f32 %v873_v43, %v874_v59  ;;  %v703_v56 = vmax.f32 %v701_v57, %v702_v2 }
 0x13b   :  { %v538_v14 = vmax.f32 %v536_v13, %v537_v58  ;;  %v591_v16 = vrot.slane %v590_v60, 2  ;;  %v815_v21 = vrot.slane %v814_v7, 4  ;;  %v928_v25 = vrot.slane %v927_v38, 4 }
 0x13c   :  { %v651_v20 = vmax.f32 %v649_v50, %v650_v3  ;;  %v763_v47 = vrot.slane %v762_v5, 1  ;;  %v1376_v27 = vrot.slane %v1375_v45, 4  ;;  %v876_v6 = vrot.slane %v875_v15, 1 }
 0x13d   :  { %v704_v61 = vrot.slane %v703_v56, 2  ;;  %v2429_v37 = vmax.f32 %v1857_v26, %v1860_v10  ;;  %v816_v49 = vmax.f32 %v814_v7, %v815_v21  ;;  %v929_v28 = vmax.f32 %v927_v38, %v928_v25 }
 0x13e   :  { %v764_v17 = vmax.f32 %v762_v5, %v763_v47  ;;  %v1420_v24 = vsel %vm1417_vm4, %v538_v14, %v651_v20  ;;  %v1100_v52 = vrot.slane %v2407_v48, 1  ;;  %v592_v36 = vmax.f32 %v590_v60, %v591_v16 }
 0x13f   :  { %v705_v0 = vmax.f32 %v703_v56, %v704_v61  ;;  %v990_v9 = vsel %vm517_vm0, %v2429_v37, -inf  ;;  %v1322_v30 = vrot.slane %v2416_v62, 2  ;;  %v1041_v31 = vmax.f32 %v1039_v53, %v1040_v32 }
 0x140   :  { %v817_v55 = vrot.slane %v816_v49, 2  ;;  %v991_v34 = vrot.slane %v990_v9, 4  ;;  %v1153_v35 = vmax.f32 %v1151_v39, %v1152_v33  ;;  %v1265_v26 = vmax.f32 %v1263_v29, %v1264_v41 }
 0x141   :  { %v1436_v13 = vsel %vm517_vm0, %v1420_v24, %v764_v17  ;;  %v930_v43 = vrot.slane %v929_v28, 2  ;;  %v1377_v46 = vmax.f32 %v1375_v45, %v1376_v27  ;;  %v877_v50 = vmax.f32 %v875_v15, %v876_v6 }
 0x142   :  { %v818_v51 = vmax.f32 %v816_v49, %v817_v55  ;;  %v1102_v57 = vsel %vm630_vm1, %v2429_v37, -inf  ;;  %v2441_v58 = vmax.f32 %v2381_v8, %v2402_v63  ;;  %v1211_v53 = vmax.f32 %v2393_v19, %v1210_v18  ;;  %v1905_v8 = vpop.f32.mrf.mxu1 }
 0x143   :  { %v593_v32 = vrot.slane %v592_v36, 1  ;;  %v706_v39 = vrot.slane %v705_v0, 1  ;;  %v1323_v29 = vmax.f32 %v2416_v62, %v1322_v30  ;;  %v1042_v33 = vrot.slane %v1041_v31, 2 }
 0x144   :  { %v1453_v41 = vsel %vm1450_vm5, %v1436_v13, %v877_v50  ;;  %v992_v45 = vmax.f32 %v990_v9, %v991_v34  ;;  %v1511_v59 = vsel %vm1501_vm8, %v2420_v54, %v2396_v22  ;;  %v1154_v60 = vrot.slane %v1153_v35, 2  ;;  %v386_v20 = vpop.f32.mrf.mxu1  ;;  %v236_v13 = vpop.f32.mrf.mxu0 }
 0x145   :  { %v931_v2 = vmax.f32 %v929_v28, %v930_v43  ;;  %v1103_v63 = vrot.slane %v1102_v57, 4  ;;  %v1101_v3 = vmax.f32 %v2407_v48, %v1100_v52  ;;  %v1266_v5 = vrot.slane %v1265_v26, 2 }
 0x146   :  { %v1378_v19 = vrot.slane %v1377_v46, 2  ;;  %v819_v18 = vrot.slane %v818_v51, 1  ;;  %v1212_v7 = vrot.slane %v1211_v53, 1  ;;  %v1470_v62 = vsel %vm1467_vm6, %v1453_v41, %v2404_v4 }
 0x147   :  { %v594_v38 = vmax.f32 %v592_v36, %v593_v32  ;;  %v707_v10 = vmax.f32 %v705_v0, %v706_v39  ;;  %v1324_v14 = vrot.slane %v1323_v29, 1  ;;  %v1043_v15 = vmax.f32 %v1041_v31, %v1042_v33  ;;  %v1908_v31 = vpop.f32.mrf.mxu1 }
 0x148   :  { %v993_v16 = vrot.slane %v992_v45, 2  ;;  %v1214_v22 = vsel %vm743_vm2, %v2429_v37, -inf  ;;  %v1528_v54 = vsel %vm1518_vm9, %v1511_v59, %v2398_v23  ;;  %v1155_v56 = vmax.f32 %v1153_v35, %v1154_v60 }
 0x149   :  { %v932_v48 = vrot.slane %v931_v2, 1  ;;  %v1104_v47 = vmax.f32 %v1102_v57, %v1103_v63  ;;  %v1267_v21 = vmax.f32 %v1265_v26, %v1266_v5  ;;  %v1379_v25 = vmax.f32 %v1377_v46, %v1378_v19 }
 0x14a   :  { %v1487_v27 = vsel %vm1484_vm7, %v1470_v62, %v1101_v3  ;;  %v820_v4 = vmax.f32 %v818_v51, %v819_v18  ;;  %v1613_v6 = vmul.f32 %v2441_v58, %v2441_v58  ;;  %v1213_v61 = vmax.f32 %v1211_v53, %v1212_v7 }
 0x14b   :  { %v1428_v17 = vsel %vm1417_vm4, %v594_v38, %v707_v10  ;;  %v1215_v24 = vrot.slane %v1214_v22, 4  ;;  %v2463_v49 = vadd.f32 %v2347_v1, %v1528_v54  ;;  %v1325_v23 = vmax.f32 %v1323_v29, %v1324_v14  ;;  %v1863_v10 = vpop.f32.mrf.mxu0 }
 0x14c   :  { %v1044_v28 = vrot.slane %v1043_v15, 1  ;;  %v994_v52 = vmax.f32 %v992_v45, %v993_v16  ;;  %v1156_v36 = vrot.slane %v1155_v56, 1  ;;  %v1504_v0 = vsel %vm1501_vm8, %v1487_v27, %v1213_v61 }
 0x14d   :  { %v933_v9 = vmax.f32 %v931_v2, %v932_v48  ;;  %v1105_v30 = vrot.slane %v1104_v47, 2  ;;  %v1268_v55 = vrot.slane %v1267_v21, 1  ;;  %v1380_v34 = vrot.slane %v1379_v25, 1 }
 0x14e   :  { %v1444_v35 = vsel %vm517_vm0, %v1428_v17, %v820_v4  ;;  %v1326_v26 = vsel %vm856_vm3, %v2429_v37, -inf  ;;  %v2471_v43 = vmax.f32 %v2374_v42, %v2389_v12  ;;  %v2475_v46 = vadd.f32 %v2441_v58, %v2376_v44  ;;  %v396_v12 = vpop.f32.mrf.mxu1 }
 0x14f   :  { %v1216_v50 = vmax.f32 %v1214_v22, %v1215_v24  ;;  %v2477_v51 = vmax.f32 %v1905_v8, %v1908_v31  ;;  %v2480_v57 = vadd.f32 %v1613_v6, %v2386_v11  ;;  %v1045_v53 = vmax.f32 %v1043_v15, %v1044_v28  ;;  %v2514_v24 = vpop.f32.mrf.mxu0 }
 0x150   :  { %v1521_v32 = vsel %vm1518_vm9, %v1504_v0, %v1325_v23  ;;  %v995_v39 = vrot.slane %v994_v52, 1  ;;  %v1461_v37 = vsel %vm1450_vm5, %v1444_v35, %v933_v9  ;;  %v1106_v29 = vmax.f32 %v1104_v47, %v1105_v30 }
 0x151   :  { %v1327_v33 = vrot.slane %v1326_v26, 4  ;;  %v497_v42 = vmax.f32 %v2423_v40, %v236_v13  ;;  %v2486_v41 = vmul.f32 0.1, %v2463_v49  ;;  %v1157_v45 = vmax.f32 %v1155_v56, %v1156_v36 }
 0x152   :  { %v2488_v59 = vmax.f32 %v1267_v21, %v1268_v55  ;;  %v2490_v60 = vmax.f32 %v1379_v25, %v1380_v34  ;;  %v2493_v11 = vadd.f32 %v2347_v1, %v1521_v32  ;;  %v1217_v2 = vrot.slane %v1216_v50, 2 }
 0x153   :  { %v1046_v8 = vsel %vm517_vm0, %v2477_v51, -inf  ;;  %v539_v63 = vsel %vm517_vm0, %v497_v42, -inf  ;;  %v1478_v40 = vsel %vm1467_vm6, %v1461_v37, %v1045_v53  ;;  %v652_v5 = vsel %vm630_vm1, %v497_v42, -inf }
 0x154   :  { %v540_v3 = vrot.slane %v539_v63, 4  ;;  %v499_v19 = vmax.f32 %v386_v20, %v396_v12  ;;  %v2500_v18 = vmax.f32 %v994_v52, %v995_v39  ;;  %v1107_v7 = vrot.slane %v1106_v29, 1  ;;  %v1866_v39 = vpop.f32.mrf.mxu0 }
 0x155   :  { %v1328_v62 = vmax.f32 %v1326_v26, %v1327_v33  ;;  %v653_v38 = vrot.slane %v652_v5, 4  ;;  %v1047_v14 = vrot.slane %v1046_v8, 4  ;;  %v765_v16 = vsel %vm743_vm2, %v497_v42, -inf }
 0x156   :  { %v541_v15 = vmax.f32 %v539_v63, %v540_v3  ;;  %v878_v22 = vsel %vm856_vm3, %v497_v42, -inf  ;;  %v2505_v54 = vsel %vm1484_vm7, %v1478_v40, %v1157_v45  ;;  %v2507_v56 = vmax.f32 %v1216_v50, %v1217_v2 }
 0x157   :  { %v654_v48 = vmax.f32 %v652_v5, %v653_v38  ;;  %v766_v47 = vrot.slane %v765_v16, 4  ;;  %v1158_v20 = vsel %vm630_vm1, %v2477_v51, -inf  ;;  %v879_v25 = vrot.slane %v878_v22, 4 }
 0x158   :  { %v542_v21 = vrot.slane %v541_v15, 2  ;;  %v595_v27 = vsel %vm517_vm0, %v499_v19, -inf  ;;  %v2512_v4 = vmax.f32 %v1106_v29, %v1107_v7  ;;  %v1329_v6 = vrot.slane %v1328_v62, 2 }
 0x159   :  { %v655_v61 = vrot.slane %v654_v48, 2  ;;  %v767_v17 = vmax.f32 %v765_v16, %v766_v47  ;;  %v2516_v23 = vmax.f32 %v1046_v8, %v1047_v14  ;;  %v880_v52 = vmax.f32 %v878_v22, %v879_v25 }
 0x15a   :  { %v543_v28 = vmax.f32 %v541_v15, %v542_v21  ;;  %v596_v36 = vrot.slane %v595_v27, 4  ;;  %v1159_v0 = vrot.slane %v1158_v20, 4  ;;  %v708_v31 = vsel %vm630_vm1, %v499_v19, -inf }
 0x15b   :  { %v656_v9 = vmax.f32 %v654_v48, %v655_v61  ;;  %v768_v30 = vrot.slane %v767_v17, 2  ;;  %v881_v34 = vrot.slane %v880_v52, 2  ;;  %v709_v26 = vrot.slane %v708_v31, 4 }
 0x15c   :  { %v544_v55 = vrot.slane %v543_v28, 1  ;;  %v597_v35 = vmax.f32 %v595_v27, %v596_v36  ;;  %v821_v53 = vsel %vm743_vm2, %v499_v19, -inf  ;;  %v934_v32 = vsel %vm856_vm3, %v499_v19, -inf }
 0x15d   :  { %v657_v13 = vrot.slane %v656_v9, 1  ;;  %v769_v50 = vmax.f32 %v767_v17, %v768_v30  ;;  %v1270_v37 = vsel %vm743_vm2, %v2477_v51, -inf  ;;  %v882_v33 = vmax.f32 %v880_v52, %v881_v34 }
 0x15e   :  { %v545_v29 = vmax.f32 %v543_v28, %v544_v55  ;;  %v710_v42 = vmax.f32 %v708_v31, %v709_v26  ;;  %v822_v2 = vrot.slane %v821_v53, 4  ;;  %v935_v8 = vrot.slane %v934_v32, 4  ;;  %v1911_v26 = vpop.f32.mrf.mxu1 }
 0x15f   :  { %v658_v12 = vmax.f32 %v656_v9, %v657_v13  ;;  %v770_v45 = vrot.slane %v769_v50, 1  ;;  %v883_v63 = vrot.slane %v882_v33, 1  ;;  %v598_v40 = vrot.slane %v597_v35, 2 }
 0x160   :  { %v711_v3 = vrot.slane %v710_v42, 2  ;;  %v502_v5 = vmax.f32 %v1863_v10, %v1866_v39  ;;  %v1271_v7 = vrot.slane %v1270_v37, 4  ;;  %v823_v19 = vmax.f32 %v821_v53, %v822_v2 }
 0x161   :  { %v771_v38 = vmax.f32 %v769_v50, %v770_v45  ;;  %v1421_v14 = vsel %vm1417_vm4, %v545_v29, %v658_v12  ;;  %v1382_v15 = vsel %vm856_vm3, %v2477_v51, -inf  ;;  %v884_v16 = vmax.f32 %v882_v33, %v883_v63  ;;  %v406_v63 = vpop.f32.mrf.mxu1 }
 0x162   :  { %v936_v22 = vmax.f32 %v934_v32, %v935_v8  ;;  %v997_v48 = vsel %vm517_vm0, %v502_v5, -inf  ;;  %v1330_v47 = vmax.f32 %v1328_v62, %v1329_v6  ;;  %v824_v25 = vrot.slane %v823_v19, 2 }
 0x163   :  { %v1437_v21 = vsel %vm517_vm0, %v1421_v14, %v771_v38  ;;  %v998_v27 = vrot.slane %v997_v48, 4  ;;  %v599_v10 = vmax.f32 %v597_v35, %v598_v40  ;;  %v712_v17 = vmax.f32 %v710_v42, %v711_v3 }
 0x164   :  { %v1454_v61 = vsel %vm1450_vm5, %v1437_v21, %v884_v16  ;;  %v1109_v28 = vsel %vm630_vm1, %v502_v5, -inf  ;;  %v1219_v52 = vrot.slane %v2507_v56, 1  ;;  %v1160_v36 = vmax.f32 %v1158_v20, %v1159_v0 }
 0x165   :  { %v1272_v9 = vmax.f32 %v1270_v37, %v1271_v7  ;;  %v1383_v51 = vrot.slane %v1382_v15, 4  ;;  %v1049_v30 = vrot.slane %v2516_v23, 2  ;;  %v1471_v62 = vsel %vm1467_vm6, %v1454_v61, %v2500_v18 }
 0x166   :  { %v937_v6 = vrot.slane %v936_v22, 2  ;;  %v1110_v31 = vrot.slane %v1109_v28, 4  ;;  %v1331_v55 = vrot.slane %v1330_v47, 1  ;;  %v825_v34 = vmax.f32 %v823_v19, %v824_v25  ;;  %v1914_v25 = vpop.f32.mrf.mxu1 }
 0x167   :  { %v999_v13 = vmax.f32 %v997_v48, %v998_v27  ;;  %v1221_v35 = vsel %vm743_vm2, %v502_v5, -inf  ;;  %v1560_v50 = vmul.f32 0.1, %v2493_v11  ;;  %v600_v53 = vrot.slane %v599_v10, 1 }
 0x168   :  { %v713_v32 = vrot.slane %v712_v17, 1  ;;  %v1111_v20 = vmax.f32 %v1109_v28, %v1110_v31  ;;  %v1161_v0 = vrot.slane %v1160_v36, 2  ;;  %v1273_v39 = vrot.slane %v1272_v9, 2  ;;  %v256_v28 = vpop.f32.mrf.mxu0 }
 0x169   :  { %v1384_v37 = vmax.f32 %v1382_v15, %v1383_v51  ;;  %v1488_v29 = vsel %vm1484_vm7, %v1471_v62, %v2512_v4  ;;  %v1512_v18 = vsel %vm1501_vm8, %v2505_v54, %v2488_v59  ;;  %v1220_v33 = vmax.f32 %v2507_v56, %v1219_v52 }
 0x16a   :  { %v938_v42 = vmax.f32 %v936_v22, %v937_v6  ;;  %v1222_v12 = vrot.slane %v1221_v35, 4  ;;  %v1332_v45 = vmax.f32 %v1330_v47, %v1331_v55  ;;  %v1050_v2 = vmax.f32 %v2516_v23, %v1049_v30 }
 0x16b   :  { %v826_v8 = vrot.slane %v825_v34, 1  ;;  %v1000_v40 = vrot.slane %v999_v13, 2  ;;  %v1505_v3 = vsel %vm1501_vm8, %v1488_v29, %v1220_v33  ;;  %v601_v7 = vmax.f32 %v599_v10, %v600_v53 }
 0x16c   :  { %v714_v38 = vmax.f32 %v712_v17, %v713_v32  ;;  %v1112_v14 = vrot.slane %v1111_v20, 2  ;;  %v1162_v4 = vmax.f32 %v1160_v36, %v1161_v0  ;;  %v1274_v19 = vmax.f32 %v1272_v9, %v1273_v39 }
 0x16d   :  { %v1385_v15 = vrot.slane %v1384_v37, 2  ;;  %v1333_v59 = vsel %vm856_vm3, %v502_v5, -inf  ;;  %v2547_v54 = vmax.f32 %v2463_v49, %v2486_v41  ;;  %v2550_v56 = vmax.f32 %v2493_v11, %v1560_v50 }
 0x16e   :  { %v939_v23 = vrot.slane %v938_v42, 1  ;;  %v1223_v16 = vmax.f32 %v1221_v35, %v1222_v12  ;;  %v1529_v22 = vsel %vm1518_vm9, %v1512_v18, %v2490_v60  ;;  %v1522_v48 = vsel %vm1518_vm9, %v1505_v3, %v1332_v45 }
 0x16f   :  { %v827_v47 = vmax.f32 %v825_v34, %v826_v8  ;;  %v1001_v21 = vmax.f32 %v999_v13, %v1000_v40  ;;  %v1429_v27 = vsel %vm1417_vm4, %v601_v7, %v714_v38  ;;  %v1113_v5 = vmax.f32 %v1111_v20, %v1112_v14 }
 0x170   :  { %v1334_v61 = vrot.slane %v1333_v59, 4  ;;  %v504_v10 = vmax.f32 %v1911_v26, %v1914_v25  ;;  %v1051_v49 = vrot.slane %v1050_v2, 1  ;;  %v1163_v41 = vrot.slane %v1162_v4, 1  ;;  %v416_v26 = vpop.f32.mrf.mxu1 }
 0x171   :  { %v1275_v17 = vrot.slane %v1274_v19, 1  ;;  %v2556_v11 = vmax.f32 %v1384_v37, %v1385_v15  ;;  %v2560_v52 = vadd.f32 %v2475_v46, %v2550_v56  ;;  %v2563_v60 = vadd.f32 %v2347_v1, %v1522_v48 }
 0x172   :  { %v940_v36 = vmax.f32 %v938_v42, %v939_v23  ;;  %v1224_v9 = vrot.slane %v1223_v16, 2  ;;  %v2567_v51 = vmul.f32 %v2550_v56, %v2550_v56  ;;  %v2570_v30 = vadd.f32 %v2347_v1, %v1529_v22 }
 0x173   :  { %v1445_v62 = vsel %vm517_vm0, %v1429_v27, %v827_v47  ;;  %v1002_v6 = vrot.slane %v1001_v21, 1  ;;  %v1114_v31 = vrot.slane %v1113_v5, 1  ;;  %v1335_v55 = vmax.f32 %v1333_v59, %v1334_v61 }
 0x174   :  { %v1053_v46 = vsel %vm517_vm0, %v504_v10, -inf  ;;  %v501_v34 = vmax.f32 %v2514_v24, %v256_v28  ;;  %v2575_v13 = vmax.f32 %v1050_v2, %v1051_v49  ;;  %v2577_v35 = vmax.f32 %v1162_v4, %v1163_v41  ;;  %v1869_v2 = vpop.f32.mrf.mxu0 }
 0x175   :  { %v2579_v50 = vmax.f32 %v1274_v19, %v1275_v17  ;;  %v1387_v53 = vrot.slane %v2556_v11, 1  ;;  %v2583_v32 = vmul.f32 0.1, %v2563_v60  ;;  %v2586_v20 = vsel %vm1450_vm5, %v1445_v62, %v940_v36 }
 0x176   :  { %v2588_v0 = vmax.f32 %v1223_v16, %v1224_v9  ;;  %v546_v39 = vsel %vm517_vm0, %v501_v34, -inf  ;;  %v1054_v24 = vrot.slane %v1053_v46, 4  ;;  %v659_v29 = vsel %vm630_vm1, %v501_v34, -inf }
 0x177   :  { %v547_v37 = vrot.slane %v546_v39, 4  ;;  %v503_v18 = vmax.f32 %v406_v63, %v416_v26  ;;  %v2592_v33 = vmax.f32 %v1001_v21, %v1002_v6  ;;  %v2594_v42 = vmax.f32 %v1113_v5, %v1114_v31  ;;  %v2606_v21 = vpop.f32.mrf.mxu0 }
 0x178   :  { %v1336_v12 = vrot.slane %v1335_v55, 2  ;;  %v660_v45 = vrot.slane %v659_v29, 4  ;;  %v1165_v8 = vsel %vm630_vm1, %v504_v10, -inf  ;;  %v772_v3 = vsel %vm743_vm2, %v501_v34, -inf }
 0x179   :  { %v548_v40 = vmax.f32 %v546_v39, %v547_v37  ;;  %v885_v7 = vsel %vm856_vm3, %v501_v34, -inf  ;;  %v1226_v38 = vrot.slane %v2588_v0, 1  ;;  %v1277_v14 = vsel %vm743_vm2, %v504_v10, -inf  ;;  %v1872_v26 = vpop.f32.mrf.mxu0 }
 0x17a   :  { %v661_v4 = vmax.f32 %v659_v29, %v660_v45  ;;  %v773_v63 = vrot.slane %v772_v3, 4  ;;  %v2601_v19 = vmax.f32 %v1053_v46, %v1054_v24  ;;  %v886_v59 = vrot.slane %v885_v7, 4 }
 0x17b   :  { %v549_v15 = vrot.slane %v548_v40, 2  ;;  %v602_v23 = vsel %vm517_vm0, %v503_v18, -inf  ;;  %v2604_v16 = vmax.f32 %v1335_v55, %v1336_v12  ;;  %v1166_v22 = vrot.slane %v1165_v8, 4 }
 0x17c   :  { %v662_v48 = vrot.slane %v661_v4, 2  ;;  %v774_v47 = vmax.f32 %v772_v3, %v773_v63  ;;  %v1278_v25 = vrot.slane %v1277_v14, 4  ;;  %v887_v5 = vmax.f32 %v885_v7, %v886_v59 }
 0x17d   :  { %v550_v27 = vmax.f32 %v548_v40, %v549_v15  ;;  %v603_v61 = vrot.slane %v602_v23, 4  ;;  %v1389_v49 = vsel %vm856_vm3, %v504_v10, -inf  ;;  %v715_v28 = vsel %vm630_vm1, %v503_v18, -inf }
 0x17e   :  { %v663_v41 = vmax.f32 %v661_v4, %v662_v48  ;;  %v775_v17 = vrot.slane %v774_v47, 2  ;;  %v888_v9 = vrot.slane %v887_v5, 2  ;;  %v716_v6 = vrot.slane %v715_v28, 4 }
 0x17f   :  { %v551_v36 = vrot.slane %v550_v27, 1  ;;  %v604_v62 = vmax.f32 %v602_v23, %v603_v61  ;;  %v828_v46 = vsel %vm743_vm2, %v503_v18, -inf  ;;  %v941_v34 = vsel %vm856_vm3, %v503_v18, -inf }
 0x180   :  { %v664_v31 = vrot.slane %v663_v41, 1  ;;  %v776_v55 = vmax.f32 %v774_v47, %v775_v17  ;;  %v889_v24 = vmax.f32 %v887_v5, %v888_v9  ;;  %v717_v29 = vmax.f32 %v715_v28, %v716_v6 }
 0x181   :  { %v552_v39 = vmax.f32 %v550_v27, %v551_v36  ;;  %v605_v37 = vrot.slane %v604_v62, 2  ;;  %v829_v45 = vrot.slane %v828_v46, 4  ;;  %v942_v40 = vrot.slane %v941_v34, 4 }
 0x182   :  { %v665_v10 = vmax.f32 %v663_v41, %v664_v31  ;;  %v777_v12 = vrot.slane %v776_v55, 1  ;;  %v890_v3 = vrot.slane %v889_v24, 1  ;;  %v718_v4 = vrot.slane %v717_v29, 2 }
 0x183   :  { %v606_v7 = vmax.f32 %v604_v62, %v605_v37  ;;  %v506_v63 = vmax.f32 %v1869_v2, %v1872_v26  ;;  %v830_v23 = vmax.f32 %v828_v46, %v829_v45  ;;  %v943_v48 = vmax.f32 %v941_v34, %v942_v40 }
 0x184   :  { %v778_v15 = vmax.f32 %v776_v55, %v777_v12  ;;  %v1422_v59 = vsel %vm1417_vm4, %v552_v39, %v665_v10  ;;  %v1390_v47 = vrot.slane %v1389_v49, 4  ;;  %v891_v18 = vmax.f32 %v889_v24, %v890_v3  ;;  %v1917_v10 = vpop.f32.mrf.mxu1 }
 0x185   :  { %v719_v61 = vmax.f32 %v717_v29, %v718_v4  ;;  %v1004_v27 = vsel %vm517_vm0, %v506_v63, -inf  ;;  %v1167_v5 = vmax.f32 %v1165_v8, %v1166_v22  ;;  %v831_v17 = vrot.slane %v830_v23, 2 }
 0x186   :  { %v1438_v41 = vsel %vm517_vm0, %v1422_v59, %v778_v15  ;;  %v944_v28 = vrot.slane %v943_v48, 2  ;;  %v1279_v36 = vmax.f32 %v1277_v14, %v1278_v25  ;;  %v607_v62 = vrot.slane %v606_v7, 1 }
 0x187   :  { %v1455_v9 = vsel %vm1450_vm5, %v1438_v41, %v891_v18  ;;  %v1116_v2 = vsel %vm630_vm1, %v506_v63, -inf  ;;  %v720_v31 = vrot.slane %v719_v61, 1  ;;  %v832_v55 = vmax.f32 %v830_v23, %v831_v17 }
 0x188   :  { %v1472_v6 = vsel %vm1467_vm6, %v1455_v9, %v2592_v33  ;;  %v1005_v46 = vrot.slane %v1004_v27, 4  ;;  %v1479_v8 = vsel %vm1467_vm6, %v2586_v20, %v2575_v13  ;;  %v1056_v22 = vrot.slane %v2601_v19, 2 }
 0x189   :  { %v1391_v34 = vmax.f32 %v1389_v49, %v1390_v47  ;;  %v1117_v26 = vrot.slane %v1116_v2, 4  ;;  %v1227_v14 = vmax.f32 %v2588_v0, %v1226_v38  ;;  %v1338_v25 = vrot.slane %v2604_v16, 1  ;;  %v426_v47 = vpop.f32.mrf.mxu1 }
 0x18a   :  { %v1489_v33 = vsel %vm1484_vm7, %v1472_v6, %v2594_v42  ;;  %v945_v39 = vmax.f32 %v943_v48, %v944_v28  ;;  %v1168_v24 = vrot.slane %v1167_v5, 2  ;;  %v1280_v37 = vrot.slane %v1279_v36, 2 }
 0x18b   :  { %v833_v29 = vrot.slane %v832_v55, 1  ;;  %v1228_v13 = vsel %vm743_vm2, %v506_v63, -inf  ;;  %v1496_v20 = vsel %vm1484_vm7, %v1479_v8, %v2577_v35  ;;  %v608_v49 = vmax.f32 %v606_v7, %v607_v62 }
 0x18c   :  { %v721_v12 = vmax.f32 %v719_v61, %v720_v31  ;;  %v1006_v45 = vmax.f32 %v1004_v27, %v1005_v46  ;;  %v1057_v0 = vmax.f32 %v2601_v19, %v1056_v22  ;;  %v1392_v38 = vrot.slane %v1391_v34, 2 }
 0x18d   :  { %v1506_v40 = vsel %vm1501_vm8, %v1489_v33, %v1227_v14  ;;  %v1118_v3 = vmax.f32 %v1116_v2, %v1117_v26  ;;  %v2636_v42 = vmax.f32 %v2563_v60, %v2583_v32  ;;  %v1339_v4 = vmax.f32 %v2604_v16, %v1338_v25  ;;  %v1920_v2 = vpop.f32.mrf.mxu1  ;;  %v2669_v14 = vld [vmem:[%s3046_s2] ss:$0 sm:$0xff] }
 0x18e   :  { %v946_v15 = vrot.slane %v945_v39, 1  ;;  %v1229_v59 = vrot.slane %v1228_v13, 4  ;;  %v1513_v35 = vsel %vm1501_vm8, %v1496_v20, %v2579_v50  ;;  %v1169_v7 = vmax.f32 %v1167_v5, %v1168_v24 }
 0x18f   :  { %v1281_v23 = vmax.f32 %v1279_v36, %v1280_v37  ;;  %v834_v48 = vmax.f32 %v832_v55, %v833_v29  ;;  %v1523_v19 = vsel %vm1518_vm9, %v1506_v40, %v1339_v4  ;;  %v1430_v18 = vsel %vm1417_vm4, %v608_v49, %v721_v12  ;;  %v276_v55 = vpop.f32.mrf.mxu0  ;;  %v436_v37 = vpop.f32.mrf.mxu1 }
 0x190   :  { %v1007_v61 = vrot.slane %v1006_v45, 2  ;;  %v1340_v27 = vsel %vm856_vm3, %v506_v63, -inf  ;;  %v1388_v60 = vmax.f32 %v2556_v11, %v1387_v53  ;;  %v1058_v32 = vrot.slane %v1057_v0, 1 }
 0x191   :  { %v1393_v16 = vmax.f32 %v1391_v34, %v1392_v38  ;;  %v1119_v41 = vrot.slane %v1118_v3, 2  ;;  %v1629_v50 = vadd.f32 %v2480_v57, %v2567_v51  ;;  %v1615_v5 = vmul.f32 %v2636_v42, %v2636_v42 }
 0x192   :  { %v947_v17 = vmax.f32 %v945_v39, %v946_v15  ;;  %v1230_v28 = vmax.f32 %v1228_v13, %v1229_v59  ;;  %v1530_v36 = vsel %vm1518_vm9, %v1513_v35, %v1388_v60  ;;  %v1546_v9 = vadd.f32 %v2347_v1, %v1523_v19  ;;  %v1875_v35 = vpop.f32.mrf.mxu0 }
 0x193   :  { %v1446_v63 = vsel %vm517_vm0, %v1430_v18, %v834_v48  ;;  %v1341_v62 = vrot.slane %v1340_v27, 4  ;;  %v1170_v11 = vrot.slane %v1169_v7, 1  ;;  %v1282_v53 = vrot.slane %v1281_v23, 1 }
 0x194   :  { %v1008_v6 = vmax.f32 %v1006_v45, %v1007_v61  ;;  %v2654_v31 = vmax.f32 %v1917_v10, %v1920_v2  ;;  %v2657_v57 = vmul.f32 0.1, %v2570_v30  ;;  %v1059_v51 = vmax.f32 %v1057_v0, %v1058_v32 }
 0x195   :  { %v1394_v46 = vrot.slane %v1393_v16, 1  ;;  %v1120_v8 = vmax.f32 %v1118_v3, %v1119_v41  ;;  %v2661_v22 = vadd.f32 %v2560_v52, %v2636_v42  ;;  %v2663_v1 = vadd.f32 %v1629_v50, %v1615_v5 }
 0x196   :  { %v1463_v34 = vsel %vm1450_vm5, %v1446_v63, %v947_v17  ;;  %v1231_v26 = vrot.slane %v1230_v28, 2  ;;  %v2672_v25 = vadd.f32 %v2669_v14, %v1530_v36  ;;  %v1562_v33 = vmul.f32 0.1, %v1546_v9  ;;  %v2703_v36 = vpop.f32.mrf.mxu0 }
 0x197   :  { %v1342_v39 = vmax.f32 %v1340_v27, %v1341_v62  ;;  %v505_v24 = vmax.f32 %v2606_v21, %v276_v55  ;;  %v1171_v52 = vmax.f32 %v1169_v7, %v1170_v11  ;;  %v2675_v29 = vmax.f32 %v1281_v23, %v1282_v53 }
 0x198   :  { %v1009_v10 = vrot.slane %v1008_v6, 1  ;;  %v1060_v13 = vsel %vm517_vm0, %v2654_v31, -inf  ;;  %v2679_v20 = vmax.f32 %v1393_v16, %v1394_v46  ;;  %v1480_v49 = vsel %vm1467_vm6, %v1463_v34, %v1059_v51 }
 0x199   :  { %v1121_v12 = vrot.slane %v1120_v8, 1  ;;  %v553_v45 = vsel %vm517_vm0, %v505_v24, -inf  ;;  %v2683_v0 = vmax.f32 %v1230_v28, %v1231_v26  ;;  %v666_v21 = vsel %vm630_vm1, %v505_v24, -inf }
 0x19a   :  { %v554_v38 = vrot.slane %v553_v45, 4  ;;  %v507_v40 = vmax.f32 %v426_v47, %v436_v37  ;;  %v2686_v3 = vmax.f32 %v1546_v9, %v1562_v33  ;;  %v1343_v4 = vrot.slane %v1342_v39, 2  ;;  %v1878_v37 = vpop.f32.mrf.mxu0 }
 0x19b   :  { %v1061_v15 = vrot.slane %v1060_v13, 4  ;;  %v667_v59 = vrot.slane %v666_v21, 4  ;;  %v2688_v7 = vmax.f32 %v1008_v6, %v1009_v10  ;;  %v779_v48 = vsel %vm743_vm2, %v505_v24, -inf }
 0x19c   :  { %v555_v23 = vmax.f32 %v553_v45, %v554_v38  ;;  %v892_v19 = vsel %vm856_vm3, %v505_v24, -inf  ;;  %v2693_v18 = vsel %vm1484_vm7, %v1480_v49, %v1171_v52  ;;  %v2695_v61 = vmax.f32 %v1120_v8, %v1121_v12 }
 0x19d   :  { %v668_v27 = vmax.f32 %v666_v21, %v667_v59  ;;  %v780_v47 = vrot.slane %v779_v48, 4  ;;  %v1233_v60 = vrot.slane %v2683_v0, 1  ;;  %v893_v16 = vrot.slane %v892_v19, 4 }
 0x19e   :  { %v556_v32 = vrot.slane %v555_v23, 2  ;;  %v609_v41 = vsel %vm517_vm0, %v507_v40, -inf  ;;  %v2699_v50 = vmax.f32 %v1342_v39, %v1343_v4  ;;  %v2701_v5 = vmax.f32 %v1060_v13, %v1061_v15 }
 0x19f   :  { %v669_v17 = vrot.slane %v668_v27, 2  ;;  %v781_v28 = vmax.f32 %v779_v48, %v780_v47  ;;  %v1172_v9 = vsel %vm630_vm1, %v2654_v31, -inf  ;;  %v894_v62 = vmax.f32 %v892_v19, %v893_v16 }
 0x1a0   :  { %v557_v63 = vmax.f32 %v555_v23, %v556_v32  ;;  %v610_v2 = vrot.slane %v609_v41, 4  ;;  %v1284_v11 = vsel %vm743_vm2, %v2654_v31, -inf  ;;  %v722_v55 = vsel %vm630_vm1, %v507_v40, -inf  ;;  %v1923_v32 = vpop.f32.mrf.mxu1 }
 0x1a1   :  { %v670_v53 = vmax.f32 %v668_v27, %v669_v17  ;;  %v782_v6 = vrot.slane %v781_v28, 2  ;;  %v895_v46 = vrot.slane %v894_v62, 2  ;;  %v723_v34 = vrot.slane %v722_v55, 4 }
 0x1a2   :  { %v558_v51 = vrot.slane %v557_v63, 1  ;;  %v611_v8 = vmax.f32 %v609_v41, %v610_v2  ;;  %v835_v39 = vsel %vm743_vm2, %v507_v40, -inf  ;;  %v948_v24 = vsel %vm856_vm3, %v507_v40, -inf }
 0x1a3   :  { %v671_v26 = vrot.slane %v670_v53, 1  ;;  %v783_v33 = vmax.f32 %v781_v28, %v782_v6  ;;  %v896_v10 = vmax.f32 %v894_v62, %v895_v46  ;;  %v724_v49 = vmax.f32 %v722_v55, %v723_v34 }
 0x1a4   :  { %v559_v52 = vmax.f32 %v557_v63, %v558_v51  ;;  %v612_v13 = vrot.slane %v611_v8, 2  ;;  %v836_v38 = vrot.slane %v835_v39, 4  ;;  %v949_v21 = vrot.slane %v948_v24, 4 }
 0x1a5   :  { %v672_v12 = vmax.f32 %v670_v53, %v671_v26  ;;  %v784_v45 = vrot.slane %v783_v33, 1  ;;  %v1173_v4 = vrot.slane %v1172_v9, 4  ;;  %v897_v15 = vrot.slane %v896_v10, 1  ;;  %v2722_v26 = vpop.f32.mrf.mxu1 }
 0x1a6   :  { %v725_v59 = vrot.slane %v724_v49, 2  ;;  %v510_v23 = vmax.f32 %v1875_v35, %v1878_v37  ;;  %v1285_v48 = vrot.slane %v1284_v11, 4  ;;  %v837_v47 = vmax.f32 %v835_v39, %v836_v38 }
 0x1a7   :  { %v785_v19 = vmax.f32 %v783_v33, %v784_v45  ;;  %v1423_v27 = vsel %vm1417_vm4, %v559_v52, %v672_v12  ;;  %v1396_v40 = vsel %vm856_vm3, %v2654_v31, -inf  ;;  %v898_v16 = vmax.f32 %v896_v10, %v897_v15 }
 0x1a8   :  { %v950_v41 = vmax.f32 %v948_v24, %v949_v21  ;;  %v1011_v17 = vsel %vm517_vm0, %v510_v23, -inf  ;;  %v613_v63 = vmax.f32 %v611_v8, %v612_v13  ;;  %v726_v62 = vmax.f32 %v724_v49, %v725_v59 }
 0x1a9   :  { %v1439_v28 = vsel %vm517_vm0, %v1423_v27, %v785_v19  ;;  %v838_v2 = vrot.slane %v837_v47, 2  ;;  %v1063_v35 = vrot.slane %v2701_v5, 2  ;;  %v1012_v6 = vrot.slane %v1011_v17, 4 }
 0x1aa   :  { %v1456_v53 = vsel %vm1450_vm5, %v1439_v28, %v898_v16  ;;  %v1123_v55 = vsel %vm630_vm1, %v510_v23, -inf  ;;  %v1174_v51 = vmax.f32 %v1172_v9, %v1173_v4  ;;  %v1286_v46 = vmax.f32 %v1284_v11, %v1285_v48 }
 0x1ab   :  { %v1397_v34 = vrot.slane %v1396_v40, 4  ;;  %v1473_v31 = vsel %vm1467_vm6, %v1456_v53, %v2688_v7  ;;  %v1234_v33 = vmax.f32 %v2683_v0, %v1233_v60  ;;  %v951_v8 = vrot.slane %v950_v41, 2  ;;  %v1926_v60 = vpop.f32.mrf.mxu1 }
 0x1ac   :  { %v1124_v39 = vrot.slane %v1123_v55, 4  ;;  %v1235_v24 = vsel %vm743_vm2, %v510_v23, -inf  ;;  %v1345_v37 = vrot.slane %v2699_v50, 1  ;;  %v614_v52 = vrot.slane %v613_v63, 1 }
 0x1ad   :  { %v727_v10 = vrot.slane %v726_v62, 1  ;;  %v839_v13 = vmax.f32 %v837_v47, %v838_v2  ;;  %v1490_v9 = vsel %vm1484_vm7, %v1473_v31, %v2695_v61  ;;  %v1013_v11 = vmax.f32 %v1011_v17, %v1012_v6 }
 0x1ae   :  { %v1125_v49 = vmax.f32 %v1123_v55, %v1124_v39  ;;  %v1236_v12 = vrot.slane %v1235_v24, 4  ;;  %v1064_v7 = vmax.f32 %v2701_v5, %v1063_v35  ;;  %v1175_v45 = vrot.slane %v1174_v51, 2 }
 0x1af   :  { %v1287_v38 = vrot.slane %v1286_v46, 2  ;;  %v1398_v0 = vmax.f32 %v1396_v40, %v1397_v34  ;;  %v952_v21 = vmax.f32 %v950_v41, %v951_v8  ;;  %v1347_v15 = vsel %vm856_vm3, %v510_v23, -inf }
 0x1b0   :  { %v1237_v4 = vmax.f32 %v1235_v24, %v1236_v12  ;;  %v2731_v59 = vmax.f32 %v1923_v32, %v1926_v60  ;;  %v1346_v48 = vmax.f32 %v2699_v50, %v1345_v37  ;;  %v1507_v19 = vsel %vm1501_vm8, %v1490_v9, %v1234_v33  ;;  %v296_v24 = vpop.f32.mrf.mxu0 }
 0x1b1   :  { %v840_v61 = vrot.slane %v839_v13, 1  ;;  %v1348_v27 = vrot.slane %v1347_v15, 4  ;;  %v615_v47 = vmax.f32 %v613_v63, %v614_v52  ;;  %v728_v16 = vmax.f32 %v726_v62, %v727_v10 }
 0x1b2   :  { %v1014_v17 = vrot.slane %v1013_v11, 2  ;;  %v1126_v5 = vrot.slane %v1125_v49, 2  ;;  %v1176_v28 = vmax.f32 %v1174_v51, %v1175_v45  ;;  %v1288_v2 = vmax.f32 %v1286_v46, %v1287_v38  ;;  %v456_v38 = vpop.f32.mrf.mxu1 }
 0x1b3   :  { %v1399_v40 = vrot.slane %v1398_v0, 2  ;;  %v1067_v41 = vsel %vm517_vm0, %v2731_v59, -inf  ;;  %v1524_v23 = vsel %vm1518_vm9, %v1507_v19, %v1346_v48  ;;  %v953_v32 = vrot.slane %v952_v21, 1 }
 0x1b4   :  { %v1238_v35 = vrot.slane %v1237_v4, 2  ;;  %v1349_v53 = vmax.f32 %v1347_v15, %v1348_v27  ;;  %v1616_v50 = vmul.f32 %v2686_v3, %v2686_v3  ;;  %v1514_v63 = vsel %vm1501_vm8, %v2693_v18, %v2675_v29 }
 0x1b5   :  { %v1065_v62 = vrot.slane %v1064_v7, 1  ;;  %v841_v6 = vmax.f32 %v839_v13, %v840_v61  ;;  %v1431_v55 = vsel %vm1417_vm4, %v615_v47, %v728_v16  ;;  %v1015_v51 = vmax.f32 %v1013_v11, %v1014_v17 }
 0x1b6   :  { %v1127_v46 = vmax.f32 %v1125_v49, %v1126_v5  ;;  %v1068_v34 = vrot.slane %v1067_v41, 4  ;;  %v1177_v31 = vrot.slane %v1176_v28, 1  ;;  %v1289_v33 = vrot.slane %v1288_v2, 1  ;;  %v1881_v5 = vpop.f32.mrf.mxu0 }
 0x1b7   :  { %v2744_v8 = vmax.f32 %v1398_v0, %v1399_v40  ;;  %v2747_v39 = vadd.f32 %v2669_v14, %v1524_v23  ;;  %v2751_v37 = vadd.f32 %v2661_v22, %v2686_v3  ;;  %v954_v29 = vmax.f32 %v952_v21, %v953_v32 }
 0x1b8   :  { %v1239_v18 = vmax.f32 %v1237_v4, %v1238_v35  ;;  %v1350_v52 = vrot.slane %v1349_v53, 2  ;;  %v2754_v10 = vadd.f32 %v2663_v1, %v1616_v50  ;;  %v2758_v13 = vsel %vm1518_vm9, %v1514_v63, %v2679_v20  ;;  %v1929_v1 = vpop.f32.mrf.mxu1 }
 0x1b9   :  { %v2760_v9 = vmax.f32 %v1064_v7, %v1065_v62  ;;  %v1447_v11 = vsel %vm517_vm0, %v1431_v55, %v841_v6  ;;  %v1016_v49 = vrot.slane %v1015_v51, 1  ;;  %v1128_v12 = vrot.slane %v1127_v46, 1 }
 0x1ba   :  { %v1069_v45 = vmax.f32 %v1067_v41, %v1068_v34  ;;  %v509_v22 = vmax.f32 %v2703_v36, %v296_v24  ;;  %v2764_v0 = vmax.f32 %v1176_v28, %v1177_v31  ;;  %v2766_v60 = vmax.f32 %v1288_v2, %v1289_v33  ;;  %v2798_v34 = vpop.f32.mrf.mxu0 }
 0x1bb   :  { %v2770_v21 = vmul.f32 0.1, %v2747_v39  ;;  %v2773_v20 = vsel %vm1450_vm5, %v1447_v11, %v954_v29  ;;  %v1240_v7 = vrot.slane %v1239_v18, 1  ;;  %v2775_v4 = vmax.f32 %v1349_v53, %v1350_v52 }
 0x1bc   :  { %v560_v15 = vsel %vm517_vm0, %v509_v22, -inf  ;;  %v1179_v36 = vsel %vm630_vm1, %v2731_v59, -inf  ;;  %v673_v19 = vsel %vm630_vm1, %v509_v22, -inf  ;;  %v511_v61 = vmax.f32 %v2722_v26, %v456_v38 }
 0x1bd   :  { %v561_v48 = vrot.slane %v560_v15, 4  ;;  %v2782_v27 = vmax.f32 %v1015_v51, %v1016_v49  ;;  %v2784_v47 = vmax.f32 %v1127_v46, %v1128_v12  ;;  %v1070_v16 = vrot.slane %v1069_v45, 2 }
 0x1be   :  { %v674_v17 = vrot.slane %v673_v19, 4  ;;  %v1291_v28 = vsel %vm743_vm2, %v2731_v59, -inf  ;;  %v786_v40 = vsel %vm743_vm2, %v509_v22, -inf  ;;  %v899_v41 = vsel %vm856_vm3, %v509_v22, -inf }
 0x1bf   :  { %v562_v2 = vmax.f32 %v560_v15, %v561_v48  ;;  %v2790_v23 = vmax.f32 %v1239_v18, %v1240_v7  ;;  %v1180_v32 = vrot.slane %v1179_v36, 4  ;;  %v787_v26 = vrot.slane %v786_v40, 4 }
 0x1c0   :  { %v675_v35 = vmax.f32 %v673_v19, %v674_v17  ;;  %v900_v63 = vrot.slane %v899_v41, 4  ;;  %v616_v62 = vsel %vm517_vm0, %v511_v61, -inf  ;;  %v1292_v6 = vrot.slane %v1291_v28, 4  ;;  %v1884_v19 = vpop.f32.mrf.mxu0 }
 0x1c1   :  { %v563_v50 = vrot.slane %v562_v2, 2  ;;  %v2796_v55 = vsel %vm856_vm3, %v2731_v59, -inf  ;;  %v788_v46 = vmax.f32 %v786_v40, %v787_v26  ;;  %v2800_v31 = vmax.f32 %v1069_v45, %v1070_v16 }
 0x1c2   :  { %v676_v51 = vrot.slane %v675_v35, 2  ;;  %v901_v24 = vmax.f32 %v899_v41, %v900_v63  ;;  %v617_v29 = vrot.slane %v616_v62, 4  ;;  %v2802_v18 = vmax.f32 %v1179_v36, %v1180_v32 }
 0x1c3   :  { %v564_v33 = vmax.f32 %v562_v2, %v563_v50  ;;  %v789_v11 = vrot.slane %v788_v46, 2  ;;  %v729_v49 = vsel %vm630_vm1, %v511_v61, -inf  ;;  %v842_v48 = vsel %vm743_vm2, %v511_v61, -inf }
 0x1c4   :  { %v677_v52 = vmax.f32 %v675_v35, %v676_v51  ;;  %v902_v22 = vrot.slane %v901_v24, 2  ;;  %v618_v38 = vmax.f32 %v616_v62, %v617_v29  ;;  %v730_v59 = vrot.slane %v729_v49, 4 }
 0x1c5   :  { %v565_v12 = vrot.slane %v564_v33, 1  ;;  %v790_v15 = vmax.f32 %v788_v46, %v789_v11  ;;  %v955_v45 = vsel %vm856_vm3, %v511_v61, -inf  ;;  %v843_v32 = vrot.slane %v842_v48, 4 }
 0x1c6   :  { %v678_v7 = vrot.slane %v677_v52, 1  ;;  %v903_v17 = vmax.f32 %v901_v24, %v902_v22  ;;  %v619_v2 = vrot.slane %v618_v38, 2  ;;  %v731_v36 = vmax.f32 %v729_v49, %v730_v59 }
 0x1c7   :  { %v566_v16 = vmax.f32 %v564_v33, %v565_v12  ;;  %v791_v41 = vrot.slane %v790_v15, 1  ;;  %v956_v35 = vrot.slane %v955_v45, 4  ;;  %v514_v62 = vmax.f32 %v1881_v5, %v1884_v19 }
 0x1c8   :  { %v679_v40 = vmax.f32 %v677_v52, %v678_v7  ;;  %v904_v26 = vrot.slane %v903_v17, 1  ;;  %v620_v50 = vmax.f32 %v618_v38, %v619_v2  ;;  %v732_v63 = vrot.slane %v731_v36, 2 }
 0x1c9   :  { %v792_v51 = vmax.f32 %v790_v15, %v791_v41  ;;  %v844_v29 = vmax.f32 %v842_v48, %v843_v32  ;;  %v957_v11 = vmax.f32 %v955_v45, %v956_v35  ;;  %v1293_v61 = vmax.f32 %v1291_v28, %v1292_v6  ;;  %v2814_v6 = vpop.f32.mrf.mxu1 }
 0x1ca   :  { %v1424_v46 = vsel %vm1417_vm4, %v566_v16, %v679_v40  ;;  %v905_v53 = vmax.f32 %v903_v17, %v904_v26  ;;  %v733_v33 = vmax.f32 %v731_v36, %v732_v63  ;;  %v1018_v24 = vsel %vm517_vm0, %v514_v62, -inf }
 0x1cb   :  { %v1440_v52 = vsel %vm517_vm0, %v1424_v46, %v792_v51  ;;  %v845_v49 = vrot.slane %v844_v29, 2  ;;  %v958_v12 = vrot.slane %v957_v11, 2  ;;  %v1019_v22 = vrot.slane %v1018_v24, 4 }
 0x1cc   :  { %v1457_v38 = vsel %vm1450_vm5, %v1440_v52, %v905_v53  ;;  %v621_v59 = vrot.slane %v620_v50, 1  ;;  %v734_v5 = vrot.slane %v733_v33, 1  ;;  %v1130_v7 = vsel %vm630_vm1, %v514_v62, -inf }
 0x1cd   :  { %v1474_v15 = vsel %vm1467_vm6, %v1457_v38, %v2782_v27  ;;  %v846_v48 = vmax.f32 %v844_v29, %v845_v49  ;;  %v959_v28 = vmax.f32 %v957_v11, %v958_v12  ;;  %v1020_v45 = vmax.f32 %v1018_v24, %v1019_v22  ;;  %v1932_v11 = vpop.f32.mrf.mxu1 }
 0x1ce   :  { %v1404_v19 = vrot.slane %v2796_v55, 4  ;;  %v1491_v16 = vsel %vm1484_vm7, %v1474_v15, %v2784_v47  ;;  %v1131_v17 = vrot.slane %v1130_v7, 4  ;;  %v1242_v53 = vsel %vm743_vm2, %v514_v62, -inf }
 0x1cf   :  { %v3051_v2 = vrot.slane %v2775_v4, 1  ;;  %v1182_v40 = vrot.slane %v2802_v18, 2  ;;  %v1508_v27 = vsel %vm1501_vm8, %v1491_v16, %v2790_v23  ;;  %v847_v41 = vrot.slane %v846_v48, 1 }
 0x1d0   :  { %v622_v32 = vmax.f32 %v620_v50, %v621_v59  ;;  %v735_v35 = vmax.f32 %v733_v33, %v734_v5  ;;  %v1132_v26 = vmax.f32 %v1130_v7, %v1131_v17  ;;  %v1243_v63 = vrot.slane %v1242_v53, 4 }
 0x1d1   :  { %v1353_v36 = vmax.f32 %v2775_v4, %v3051_v2  ;;  %v1481_v47 = vsel %vm1467_vm6, %v2773_v20, %v2760_v9  ;;  %v1294_v51 = vrot.slane %v1293_v61, 2  ;;  %v960_v46 = vrot.slane %v959_v28, 1 }
 0x1d2   :  { %v1021_v29 = vrot.slane %v1020_v45, 2  ;;  %v1244_v24 = vmax.f32 %v1242_v53, %v1243_v63  ;;  %v1354_v52 = vsel %vm856_vm3, %v514_v62, -inf  ;;  %v516_v49 = vmax.f32 %v1929_v1, %v1932_v11 }
 0x1d3   :  { %v1525_v4 = vsel %vm1518_vm9, %v1508_v27, %v1353_v36  ;;  %v1183_v23 = vmax.f32 %v2802_v18, %v1182_v40  ;;  %v1405_v50 = vmax.f32 %v2796_v55, %v1404_v19  ;;  %v848_v33 = vmax.f32 %v846_v48, %v847_v41 }
 0x1d4   :  { %v1355_v12 = vrot.slane %v1354_v52, 4  ;;  %v2835_v22 = vmax.f32 %v2747_v39, %v2770_v21  ;;  %v1072_v9 = vrot.slane %v2800_v31, 1  ;;  %v1432_v20 = vsel %vm1417_vm4, %v622_v32, %v735_v35 }
 0x1d5   :  { %v1133_v38 = vrot.slane %v1132_v26, 2  ;;  %v1295_v59 = vmax.f32 %v1293_v61, %v1294_v51  ;;  %v1548_v5 = vadd.f32 %v2669_v14, %v1525_v4  ;;  %v1022_v62 = vmax.f32 %v1020_v45, %v1021_v29  ;;  %v476_v29 = vpop.f32.mrf.mxu1 }
 0x1d6   :  { %3052 = vst [vmem:[#allocation2_spill] sm:$0xff] %v2835_v22  ;;  %v1074_v1 = vsel %vm517_vm0, %v516_v49, -inf  ;;  %v3053_v18 = vrot.slane %v2744_v8, 1  ;;  %v1498_v39 = vsel %vm1484_vm7, %v1481_v47, %v2764_v0  ;;  %v961_v21 = vmax.f32 %v959_v28, %v960_v46  ;;  %v316_v28 = vpop.f32.mrf.mxu0 }
 0x1d7   :  { %v1245_v7 = vrot.slane %v1244_v24, 2  ;;  %v1184_v15 = vrot.slane %v1183_v23, 1  ;;  %v1406_v48 = vrot.slane %v1405_v50, 2  ;;  %v1448_v19 = vsel %vm517_vm0, %v1432_v20, %v848_v33 }
 0x1d8   :  { %v2844_v55 = vmax.f32 %v2744_v8, %v3053_v18  ;;  %v1356_v61 = vmax.f32 %v1354_v52, %v1355_v12  ;;  %v2851_v45 = vadd.f32 %v2751_v37, %v2835_v22  ;;  %v1073_v16 = vmax.f32 %v2800_v31, %v1072_v9 }
 0x1d9   :  { %v1134_v17 = vmax.f32 %v1132_v26, %v1133_v38  ;;  %v1075_v53 = vrot.slane %v1074_v1, 4  ;;  %v1296_v8 = vrot.slane %v1295_v59, 1  ;;  %v1564_v2 = vmul.f32 0.1, %v1548_v5 }
 0x1da   :  { %v1023_v36 = vrot.slane %v1022_v62, 1  ;;  %v1186_v0 = vsel %vm630_vm1, %v516_v49, -inf  ;;  %v2857_v40 = vmul.f32 %v2835_v22, %v2835_v22  ;;  %v2861_v27 = vsel %vm1501_vm8, %v1498_v39, %v2766_v60 }
 0x1db   :  { %v1465_v37 = vsel %vm1450_vm5, %v1448_v19, %v961_v21  ;;  %v1246_v41 = vmax.f32 %v1244_v24, %v1245_v7  ;;  %v2864_v31 = vmax.f32 %v1183_v23, %v1184_v15  ;;  %v2866_v32 = vmax.f32 %v1405_v50, %v1406_v48 }
 0x1dc   :  { %v1357_v35 = vrot.slane %v1356_v61, 2  ;;  %v1298_v26 = vsel %vm743_vm2, %v516_v49, -inf  ;;  %v1135_v63 = vrot.slane %v1134_v17, 1  ;;  %v1076_v47 = vmax.f32 %v1074_v1, %v1075_v53 }
 0x1dd   :  { %v1187_v51 = vrot.slane %v1186_v0, 4  ;;  %v513_v46 = vmax.f32 %v2798_v34, %v316_v28  ;;  %v2870_v11 = vmax.f32 %v1295_v59, %v1296_v8  ;;  %v2872_v60 = vmax.f32 %v1548_v5, %v1564_v2 }
 0x1de   :  { %v2875_v4 = vsel %vm1467_vm6, %v1465_v37, %v1073_v16  ;;  %v2877_v24 = vmax.f32 %v1022_v62, %v1023_v36  ;;  %v1247_v52 = vrot.slane %v1246_v41, 1  ;;  %v1299_v23 = vrot.slane %v1298_v26, 4 }
 0x1df   :  { %v1410_v50 = vsel %vm856_vm3, %v516_v49, -inf  ;;  %v567_v33 = vsel %vm517_vm0, %v513_v46, -inf  ;;  %v2881_v12 = vmax.f32 %v1356_v61, %v1357_v35  ;;  %v680_v34 = vsel %vm630_vm1, %v513_v46, -inf }
 0x1e0   :  { %v568_v9 = vrot.slane %v567_v33, 4  ;;  %v515_v20 = vmax.f32 %v2814_v6, %v476_v29  ;;  %v2885_v38 = vmax.f32 %v1134_v17, %v1135_v63  ;;  %v1077_v59 = vrot.slane %v1076_v47, 2 }
 0x1e1   :  { %v1188_v5 = vmax.f32 %v1186_v0, %v1187_v51  ;;  %v681_v1 = vrot.slane %v680_v34, 4  ;;  %v1411_v62 = vrot.slane %v1410_v50, 4  ;;  %v793_v39 = vsel %vm743_vm2, %v513_v46, -inf }
 0x1e2   :  { %v569_v18 = vmax.f32 %v567_v33, %v568_v9  ;;  %v906_v49 = vsel %vm856_vm3, %v513_v46, -inf  ;;  %v2889_v21 = vmax.f32 %v1246_v41, %v1247_v52  ;;  %v1300_v7 = vmax.f32 %v1298_v26, %v1299_v23 }
 0x1e3   :  { %v682_v15 = vmax.f32 %v680_v34, %v681_v1  ;;  %v794_v48 = vrot.slane %v793_v39, 4  ;;  %v1359_v19 = vrot.slane %v2881_v12, 1  ;;  %v907_v6 = vrot.slane %v906_v49, 4 }
 0x1e4   :  { %v570_v61 = vrot.slane %v569_v18, 2  ;;  %v623_v16 = vsel %vm517_vm0, %v515_v20, -inf  ;;  %v2893_v17 = vmax.f32 %v1076_v47, %v1077_v59  ;;  %v1189_v53 = vrot.slane %v1188_v5, 2 }
 0x1e5   :  { %v683_v8 = vrot.slane %v682_v15, 2  ;;  %v795_v2 = vmax.f32 %v793_v39, %v794_v48  ;;  %v1412_v36 = vmax.f32 %v1410_v50, %v1411_v62  ;;  %v908_v28 = vmax.f32 %v906_v49, %v907_v6 }
 0x1e6   :  { %v571_v0 = vmax.f32 %v569_v18, %v570_v61  ;;  %v624_v37 = vrot.slane %v623_v16, 4  ;;  %v1301_v41 = vrot.slane %v1300_v7, 2  ;;  %v736_v63 = vsel %vm630_vm1, %v515_v20, -inf }
 0x1e7   :  { %v684_v35 = vmax.f32 %v682_v15, %v683_v8  ;;  %v796_v26 = vrot.slane %v795_v2, 2  ;;  %v909_v46 = vrot.slane %v908_v28, 2  ;;  %v737_v52 = vrot.slane %v736_v63, 4 }
 0x1e8   :  { %v572_v51 = vrot.slane %v571_v0, 1  ;;  %v625_v29 = vmax.f32 %v623_v16, %v624_v37  ;;  %v849_v47 = vsel %vm743_vm2, %v515_v20, -inf  ;;  %v962_v9 = vsel %vm856_vm3, %v515_v20, -inf }
 0x1e9   :  { %v685_v23 = vrot.slane %v684_v35, 1  ;;  %v797_v33 = vmax.f32 %v795_v2, %v796_v26  ;;  %v910_v50 = vmax.f32 %v908_v28, %v909_v46  ;;  %v738_v1 = vmax.f32 %v736_v63, %v737_v52 }
 0x1ea   :  { %v573_v34 = vmax.f32 %v571_v0, %v572_v51  ;;  %v626_v59 = vrot.slane %v625_v29, 2  ;;  %v850_v39 = vrot.slane %v849_v47, 4  ;;  %v963_v49 = vrot.slane %v962_v9, 4 }
 0x1eb   :  { %v686_v62 = vmax.f32 %v684_v35, %v685_v23  ;;  %v798_v18 = vrot.slane %v797_v33, 1  ;;  %v1190_v15 = vmax.f32 %v1188_v5, %v1189_v53  ;;  %v911_v48 = vrot.slane %v910_v50, 1 }
 0x1ec   :  { %v627_v61 = vmax.f32 %v625_v29, %v626_v59  ;;  %v739_v6 = vrot.slane %v738_v1, 2  ;;  %v851_v2 = vmax.f32 %v849_v47, %v850_v39  ;;  %v964_v37 = vmax.f32 %v962_v9, %v963_v49 }
 0x1ed   :  { %v799_v16 = vmax.f32 %v797_v33, %v798_v18  ;;  %v1425_v8 = vsel %vm1417_vm4, %v573_v34, %v686_v62  ;;  %v1413_v26 = vrot.slane %v1412_v36, 2  ;;  %v912_v22 = vmax.f32 %v910_v50, %v911_v48 }
 0x1ee   :  { %v628_v20 = vrot.slane %v627_v61, 1  ;;  %v740_v0 = vmax.f32 %v738_v1, %v739_v6  ;;  %v1302_v28 = vmax.f32 %v1300_v7, %v1301_v41  ;;  %v852_v35 = vrot.slane %v851_v2, 2 }
 0x1ef   :  { %v1441_v63 = vsel %vm517_vm0, %v1425_v8, %v799_v16  ;;  %v965_v51 = vrot.slane %v964_v37, 2  ;;  %v1360_v46 = vmax.f32 %v2881_v12, %v1359_v19  ;;  %v1079_v52 = vrot.slane %v2893_v17, 1 }
 0x1f0   :  { %v1458_v5 = vsel %vm1450_vm5, %v1441_v63, %v912_v22  ;;  %v629_v53 = vmax.f32 %v627_v61, %v628_v20  ;;  %v741_v29 = vrot.slane %v740_v0, 1  ;;  %v853_v33 = vmax.f32 %v851_v2, %v852_v35 }
 0x1f1   :  { %v1475_v23 = vsel %vm1467_vm6, %v1458_v5, %v2877_v24  ;;  %v966_v47 = vmax.f32 %v964_v37, %v965_v51  ;;  %v1191_v9 = vrot.slane %v1190_v15, 1  ;;  %v1414_v34 = vmax.f32 %v1412_v36, %v1413_v26 }
 0x1f2   :  { %v1492_v7 = vsel %vm1484_vm7, %v1475_v23, %v2885_v38  ;;  %v742_v41 = vmax.f32 %v740_v0, %v741_v29  ;;  %v1303_v50 = vrot.slane %v1302_v28, 1  ;;  %v854_v22 = vrot.slane %v853_v33, 1 }
 0x1f3   :  { %v1509_v12 = vsel %vm1501_vm8, %v1492_v7, %v2889_v21  ;;  %v967_v19 = vrot.slane %v966_v47, 1  ;;  %v1408_v59 = vrot.slane %v2866_v32, 1  ;;  %v1499_v24 = vsel %vm1484_vm7, %v2875_v4, %v2864_v31 }
 0x1f4   :  { %v1526_v1 = vsel %vm1518_vm9, %v1509_v12, %v1360_v46  ;;  %v1433_v36 = vsel %vm1417_vm4, %v629_v53, %v742_v41  ;;  %v1080_v62 = vmax.f32 %v2893_v17, %v1079_v52  ;;  %v855_v18 = vmax.f32 %v853_v33, %v854_v22 }
 0x1f5   :  { %v1549_v38 = vadd.f32 %v2669_v14, %v1526_v1  ;;  %v968_v39 = vmax.f32 %v966_v47, %v967_v19  ;;  %v1532_v21 = vsel %vm1518_vm9, %v2861_v27, %v2844_v55  ;;  %v1618_v49 = vmul.f32 %v2872_v60, %v2872_v60 }
 0x1f6   :  { %v1192_v48 = vmax.f32 %v1190_v15, %v1191_v9  ;;  %v1415_v61 = vrot.slane %v1414_v34, 1  ;;  %v1516_v31 = vsel %vm1501_vm8, %v1499_v24, %v2870_v11  ;;  %v1304_v4 = vmax.f32 %v1302_v28, %v1303_v50 }
 0x1f7   :  { %v1565_v6 = vmul.f32 0.1, %v1549_v38  ;;  %v1449_v17 = vsel %vm517_vm0, %v1433_v36, %v855_v18  ;;  %v1569_v16 = vmul.f32 0.1, %v2672_v25  ;;  %v1554_v8 = vadd.f32 %v2669_v14, %v2758_v13 }
 0x1f8   :  { %v1409_v2 = vmax.f32 %v2866_v32, %v1408_v59  ;;  %v1466_v55 = vsel %vm1450_vm5, %v1449_v17, %v968_v39  ;;  %v1632_v27 = vadd.f32 %v2754_v10, %v2857_v40  ;;  %v1595_v15 = vadd.f32 %v2851_v45, %v2872_v60 }
 0x1f9   :  { %v2934_v11 = vmax.f32 %v1549_v38, %v1565_v6  ;;  %v1483_v37 = vsel %vm1467_vm6, %v1466_v55, %v1080_v62  ;;  %v1555_v26 = vadd.f32 %v2669_v14, %v1532_v21  ;;  %v1416_v0 = vmax.f32 %v1414_v34, %v1415_v61 }
 0x1fa   :  { %v1533_v20 = vsel %vm1518_vm9, %v1516_v31, %v1409_v2  ;;  %v1500_v13 = vsel %vm1484_vm7, %v1483_v37, %v1192_v48  ;;  %v1633_v32 = vadd.f32 %v1632_v27, %v1618_v49  ;;  %v1620_v45 = vmul.f32 %v2471_v43, %v2471_v43 }
 0x1fb   :  { %v1596_v28 = vadd.f32 %v1595_v15, %v2934_v11  ;;  %v1619_v10 = vmul.f32 %v2934_v11, %v2934_v11  ;;  %v1517_v40 = vsel %vm1501_vm8, %v1500_v13, %v1304_v4  ;;  %v2948_v63 = vmax.f32 %v2570_v30, %v2657_v57 }
 0x1fc   :  { %v1534_v35 = vsel %vm1518_vm9, %v1517_v40, %v1416_v0  ;;  %v1570_v51 = vmul.f32 0.1, %v1554_v8  ;;  %v1556_v46 = vadd.f32 %v2669_v14, %v1533_v20  ;;  %v1621_v29 = vmul.f32 %v2547_v54, %v2547_v54 }
 0x1fd   :  { %v1597_v5 = vadd.f32 %v1596_v28, %v2471_v43  ;;  %v1634_v53 = vadd.f32 %v1633_v32, %v1619_v10  ;;  %v2956_v52 = vmax.f32 %v2672_v25, %v1569_v16  ;;  %v1571_v23 = vmul.f32 0.1, %v1555_v26 }
 0x1fe   :  { %v1557_v30 = vadd.f32 %v2669_v14, %v1534_v35  ;;  %v1622_v57 = vmul.f32 %v2948_v63, %v2948_v63  ;;  %v2962_v9 = vmax.f32 %v1554_v8, %v1570_v51  ;;  %v1572_v34 = vmul.f32 0.1, %v1556_v46 }
 0x1ff   :  { %v1598_v33 = vadd.f32 %v1597_v5, %v2547_v54  ;;  %v1635_v47 = vadd.f32 %v1634_v53, %v1620_v45  ;;  %v1623_v50 = vmul.f32 %v2956_v52, %v2956_v52  ;;  %v2967_v25 = vmax.f32 %v1555_v26, %v1571_v23  ;;  %v1657_v23 = vld [vmem:[%s3048_s4] sm:$0x1] }
 0x200   :  { %v1573_v22 = vmul.f32 0.1, %v1557_v30  ;;  %v1624_v14 = vmul.f32 %v2962_v9, %v2962_v9  ;;  %v1588_v59 = vmax.f32 %v1556_v46, %v1572_v34  ;;  %v1661_v35 = vlaneseq  ;;  %v1655_v46 = vld [vmem:[%s3047_s3] sm:$0x1] }
 0x201   :  { %v1599_v7 = vadd.f32 %v1598_v33, %v2948_v63  ;;  %v1636_v41 = vadd.f32 %v1635_v47, %v1621_v29  ;;  %v1625_v36 = vmul.f32 %v2967_v25, %v2967_v25 }
 0x202   :  { %v1589_v62 = vmax.f32 %v1557_v30, %v1573_v22  ;;  %v1626_v39 = vmul.f32 %v1588_v59, %v1588_v59  ;;  %v1662_v51 = vshrl.u32 %v1661_v35, 7 }
 0x203   :  { %v1637_v12 = vadd.f32 %v1636_v41, %v1622_v57  ;;  %v1600_v19 = vadd.f32 %v1599_v7, %v2956_v52 }
 0x204   :  { %v1627_v61 = vmul.f32 %v1589_v62, %v1589_v62  ;;  %v1663_v5 = vsub.s32 0, %v1662_v51 }
 0x205   :  { %v1601_v24 = vadd.f32 %v1600_v19, %v2962_v9  ;;  %v1638_v1 = vadd.f32 %v1637_v12, %v1623_v50  ;;  %v3054_v12 = vld [vmem:[#allocation2_spill] sm:$0xff] }
 0x207   :  { %v1602_v38 = vadd.f32 %v1601_v24, %v2967_v25  ;;  %v1639_v18 = vadd.f32 %v1638_v1, %v1624_v14 }
 0x209   :  { %v1603_v21 = vadd.f32 %v1602_v38, %v1588_v59  ;;  %v1640_v49 = vadd.f32 %v1639_v18, %v1625_v36 }
 0x20b   :  { %v1604_v48 = vadd.f32 %v1603_v21, %v1589_v62  ;;  %v1641_v31 = vadd.f32 %v1640_v49, %v1626_v39 }
 0x20d   :  { %v1605_v4 = vrot.slane %v1604_v48, 4  ;;  %v1642_v6 = vadd.f32 %v1641_v31, %v1627_v61 }
 0x20f   :  { %v1606_v17 = vadd.f32 %v1605_v4, %v1604_v48  ;;  %v1643_v16 = vrot.slane %v1642_v6, 4 }
 0x211   :  { %v1607_v8 = vrot.slane %v1606_v17, 2  ;;  %v1644_v2 = vadd.f32 %v1643_v16, %v1642_v6 }
 0x213   :  { %v1608_v55 = vadd.f32 %v1607_v8, %v1606_v17  ;;  %v1645_v27 = vrot.slane %v1644_v2, 2 }
 0x215   :  { %v1609_v15 = vrot.slane %v1608_v55, 1  ;;  %v1646_v37 = vadd.f32 %v1645_v27, %v1644_v2 }
 0x217   :  { %v1610_v26 = vadd.f32 %v1609_v15, %v1608_v55  ;;  %v1647_v20 = vrot.slane %v1646_v37, 1 }
 0x219   :  { %v1611_v0 = vmul.f32 0.0078125, %v1610_v26  ;;  %v1648_v13 = vadd.f32 %v1647_v20, %v1646_v37 }
 0x21b   :  { %v1649_v32 = vmul.f32 0.0078125, %v1648_v13  ;;  %v1650_v28 = vmul.f32 %v1611_v0, %v1611_v0 }
 0x21d   :  { %v1651_v10 = vsub.f32 %v1649_v32, %v1650_v28 }
 0x21f   :  { %v1652_v40 = vmax.f32 %v1651_v10, 0.0 }
 0x221   :  { %v1653_v45 = vadd.f32 1e-05, %v1652_v40 }
 0x223   :  { %1965 = vrsqrt.f32 %v1653_v45 }
 0x230   :  { %v1966_v53 = vpop.eup %1965 }
 0x231   :  { %v1656_v29 = vmul.f32 %v1966_v53, %v1655_v46 }
 0x233   :  { %v1658_v33 = vmul.f32 %v1656_v29, %v1611_v0  ;;  %v1664_v47 = vrot.slane %v1656_v29, %v1663_v5 }
 0x235   :  { %v1659_v30 = vsub.f32 %v1657_v23, %v1658_v33  ;;  %v1666_v57 = vmul.f32 %v1664_v47, %v2376_v44  ;;  %v1667_v34 = vmul.f32 %v1664_v47, %v2441_v58  ;;  %v1668_v7 = vmul.f32 %v1664_v47, %v2550_v56 }
 0x236   :  { %v1669_v41 = vmul.f32 %v1664_v47, %v2636_v42  ;;  %v1670_v50 = vmul.f32 %v1664_v47, %v2686_v3  ;;  %v1671_v22 = vmul.f32 %v1664_v47, %v3054_v12  ;;  %v1672_v19 = vmul.f32 %v1664_v47, %v2872_v60 }
 0x237   :  { %v1673_v14 = vmul.f32 %v1664_v47, %v2934_v11  ;;  %v1674_v24 = vmul.f32 %v1664_v47, %v2471_v43  ;;  %v1675_v1 = vmul.f32 %v1664_v47, %v2547_v54  ;;  %v1676_v44 = vmul.f32 %v1664_v47, %v2948_v63 }
 0x238   :  { %v1677_v58 = vmul.f32 %v1664_v47, %v2956_v52  ;;  %v1686_v36 = vrot.slane %v1659_v30, %v1663_v5  ;;  %v1678_v56 = vmul.f32 %v1664_v47, %v2962_v9  ;;  %v1679_v42 = vmul.f32 %v1664_v47, %v2967_v25 }
 0x239   :  { %v1680_v3 = vmul.f32 %v1664_v47, %v1588_v59  ;;  %v1681_v38 = vmul.f32 %v1664_v47, %v1589_v62 }
 0x23a   :  { %v1688_v18 = vadd.f32 %v1686_v36, %v1666_v57  ;;  %v1689_v39 = vadd.f32 %v1686_v36, %v1667_v34  ;;  %v1690_v60 = vadd.f32 %v1686_v36, %v1668_v7  ;;  %v1691_v21 = vadd.f32 %v1686_v36, %v1669_v41 }
 0x23b   :  { %v1692_v11 = vadd.f32 %v1686_v36, %v1670_v50  ;;  %v1693_v49 = vadd.f32 %v1686_v36, %v1671_v22  ;;  %v1694_v43 = vadd.f32 %v1686_v36, %v1672_v19  ;;  %v1695_v48 = vadd.f32 %v1686_v36, %v1673_v14 }
 0x23c   :  { %v1696_v54 = vadd.f32 %v1686_v36, %v1674_v24  ;;  %v1697_v61 = vadd.f32 %v1686_v36, %v1675_v1  ;;  %v1698_v63 = vadd.f32 %v1686_v36, %v1676_v44  ;;  %v1699_v31 = vadd.f32 %v1686_v36, %v1677_v58  ;;  %1704 = vst [vmem:[%s3049_s5] sm:$0xff] %v1688_v18 }
 0x23d   :  { %1705 = vst [vmem:[%s3049_s5 + $0x8] sm:$0xff] %v1689_v39  ;;  %1706 = vst [vmem:[%s3049_s5 + $0x10] sm:$0xff] %v1690_v60  ;;  %v1700_v52 = vadd.f32 %v1686_v36, %v1678_v56  ;;  %v1701_v9 = vadd.f32 %v1686_v36, %v1679_v42  ;;  %v1702_v25 = vadd.f32 %v1686_v36, %v1680_v3 }
 0x23e   :  { %1707 = vst [vmem:[%s3049_s5 + $0x18] sm:$0xff] %v1691_v21  ;;  %v1703_v59 = vadd.f32 %v1686_v36, %v1681_v38  ;;  %1708 = vst [vmem:[%s3049_s5 + $0x20] sm:$0xff] %v1692_v11 }
 0x23f   :  { %1709 = vst [vmem:[%s3049_s5 + $0x28] sm:$0xff] %v1693_v49  ;;  %1710 = vst [vmem:[%s3049_s5 + $0x30] sm:$0xff] %v1694_v43 }
 0x240   :  { %1711 = vst [vmem:[%s3049_s5 + $0x38] sm:$0xff] %v1695_v48  ;;  %1712 = vst [vmem:[%s3049_s5 + $0x40] sm:$0xff] %v1696_v54 }
 0x241   :  { %1713 = vst [vmem:[%s3049_s5 + $0x48] sm:$0xff] %v1697_v61  ;;  %1714 = vst [vmem:[%s3049_s5 + $0x50] sm:$0xff] %v1698_v63 }
 0x242   :  { %1715 = vst [vmem:[%s3049_s5 + $0x58] sm:$0xff] %v1699_v31  ;;  %1716 = vst [vmem:[%s3049_s5 + $0x60] sm:$0xff] %v1700_v52 }
 0x243   :  { %1717 = vst [vmem:[%s3049_s5 + $0x68] sm:$0xff] %v1701_v9  ;;  %1718 = vst [vmem:[%s3049_s5 + $0x70] sm:$0xff] %v1702_v25 }
 0x244   :  { %1719 = vst [vmem:[%s3049_s5 + $0x78] sm:$0xff] %v1703_v59 }

</bundles_post_ra>
